<compile_context>
chip_gen: v5e
topology: v5e:2x2
jax: 0.10.0
libtpu: 0.0.40
codegen_flags: <defaults>
</compile_context>

<pallas_src>
import jax
import jax.numpy as jnp
from jax.experimental import pallas as pl
from jax.experimental.pallas import tpu as pltpu


def _round_up(n, m):
    return ((n + m - 1) // m) * m


def _dnn_kernel(x_ref, w1_ref, b1_ref, w23_ref, b23_ref, o_ref):
    # In-kernel VPU cast of the x tile to bf16, then bf16 x bf16 -> f32 on MXU.
    x_bf = x_ref[...].astype(jnp.bfloat16)
    h1 = jnp.dot(x_bf, w1_ref[...], preferred_element_type=jnp.float32)
    h1 = jnp.maximum(h1 + b1_ref[...], 0.0)              # (TB, 512), ReLU
    # dropout: identity at inference.
    # fc3(fc2(.)) folded into one 512-wide row; VPU multiply + lane reduce.
    out = jnp.sum(h1 * w23_ref[...], axis=-1, keepdims=True) + b23_ref[...]
    o_ref[...] = out.astype(o_ref.dtype)


def prepare_dnn_params(w1, b1, w2, b2, w3, b3):
    """One-time weight preparation (do NOT call per forward).

    Returns (w1_bf16, b1_f32, w23_f32, b23_f32) where
      w23 = (w2 @ w3)^T   shape (1, 512)
      b23 = b2 @ w3 + b3  shape (1, 1)
    The fc2->fc3 fold is exact because there is no nonlinearity between them.
    """
    w1_bf = w1.astype(jnp.bfloat16)                       # (D, 512)
    b1f = b1.astype(jnp.float32)                          # (1, 512)
    w23 = jnp.transpose(w2 @ w3).astype(jnp.float32)      # (1, 512)
    b23 = (b2 @ w3 + b3).astype(jnp.float32)              # (1, 1)
    return w1_bf, b1f, w23, b23


def _pick_tb(b_rows):
    """Batch tile rows: single tile up to 128; otherwise 128..512 rows with
    >=2 grid steps so v7x can shard tiles across both TensorCores."""
    if b_rows <= 128:
        return b_rows
    n_tiles = max(2, pl.cdiv(b_rows, 512))
    tb = _round_up(pl.cdiv(b_rows, n_tiles), 8)
    return min(512, max(128, tb))


def dnn_forward(x, prepared_params):
    """x: (B, D) f32.  prepared_params from prepare_dnn_params().
    Returns (B, 1) f32 == fc3(fc2(relu(fc1(x)))), dropout = identity."""
    w1_bf, b1, w23, b23 = prepared_params
    B, D = x.shape
    H1 = w1_bf.shape[1]                                   # 512
    assert w1_bf.shape[0] == D

    # --- batch tiling (rows padded to a sublane multiple of 8) ---------------
    B8 = _round_up(B, 8)
    TB = _pick_tb(B8)
    B_pad = _round_up(B8, TB)
    if B_pad != B:
        x = jnp.pad(x, ((0, B_pad - B), (0, 0)))

    grid = (B_pad // TB,)
    out = pl.pallas_call(
        _dnn_kernel,
        out_shape=jax.ShapeDtypeStruct((B_pad, 1), jnp.float32),
        grid_spec=pltpu.PrefetchScalarGridSpec(
            num_scalar_prefetch=0,
            grid=grid,
            in_specs=[
                pl.BlockSpec((TB, D), lambda i: (i, 0)),   # x tile (f32, pipelined)
                pl.BlockSpec((D, H1), lambda i: (0, 0)),   # w1 bf16 (resident)
                pl.BlockSpec((1, H1), lambda i: (0, 0)),   # b1 (resident)
                pl.BlockSpec((1, H1), lambda i: (0, 0)),   # folded (w2@w3)^T row
                pl.BlockSpec((1, 1), lambda i: (0, 0)),    # folded bias
            ],
            out_specs=pl.BlockSpec((TB, 1), lambda i: (i, 0)),
        ),
        compiler_params=pltpu.CompilerParams(
            dimension_semantics=("parallel",),  # shard batch tiles across TCs when grid >= 2
        ),
    )(x, w1_bf, b1, w23, b23)
    return out[:B]


def init_params(key, species_len, lysis_len):
    d_in = 1024 + species_len + lysis_len
    dims = [(d_in, 512), (512, 128), (128, 1)]
    params = []
    for fi, fo in dims:
        kw, kb, key = jax.random.split(key, 3)
        scale = 1.0 / jnp.sqrt(fi)
        w = jax.random.uniform(kw, (fi, fo), jnp.float32, -scale, scale)
        b = jax.random.uniform(kb, (1, fo), jnp.float32, -scale, scale)
        params += [w, b]
    return params


def reference_forward(x, w1, b1, w2, b2, w3, b3):
    h1 = jnp.maximum(x @ w1 + b1, 0.0)   # dropout = identity at inference
    h2 = h1 @ w2 + b2
    return h2 @ w3 + b3


if __name__ == "__main__":
    species_len, lysis_len = 8, 8
    D = 1024 + species_len + lysis_len   # 1040

    key = jax.random.PRNGKey(0)
    kx, kx2, kp = jax.random.split(key, 3)
    w1, b1, w2, b2, w3, b3 = init_params(kp, species_len, lysis_len)
    prepared = prepare_dnn_params(w1, b1, w2, b2, w3, b3)

    # Small-batch path (single tile).
    B = 8
    x = jax.random.normal(kx, (B, D), jnp.float32)
    out = jax.block_until_ready(dnn_forward(x, prepared))
    ref = reference_forward(x, w1, b1, w2, b2, w3, b3)
    assert out.shape == (B, 1)
    # Loose tolerance: x/w1 go through bf16 on the MXU (f32 accumulation).
    assert jnp.allclose(out, ref, atol=5e-2, rtol=5e-2), float(jnp.max(jnp.abs(out - ref)))

    # Multi-tile path (grid of 2, exercises batch tiling / parallel sharding).
    B2 = 272
    x2 = jax.random.normal(kx2, (B2, D), jnp.float32)
    out2 = jax.block_until_ready(dnn_forward(x2, prepared))
    ref2 = reference_forward(x2, w1, b1, w2, b2, w3, b3)
    assert out2.shape == (B2, 1)
    assert jnp.allclose(out2, ref2, atol=5e-2, rtol=5e-2), float(jnp.max(jnp.abs(out2 - ref2)))

    print("KERNEL_OK")
</pallas_src>

<mosaic_0001>
module attributes {stable_mosaic.version = 11 : i64} {
  func.func @_dnn_kernel(%arg0: i32, %arg1: memref<8x1040xf32, #tpu.memory_space<vmem>>, %arg2: memref<1040x512xbf16, #tpu.memory_space<vmem>>, %arg3: memref<1x512xf32, #tpu.memory_space<vmem>>, %arg4: memref<1x512xf32, #tpu.memory_space<vmem>>, %arg5: memref<1x1xf32, #tpu.memory_space<vmem>>, %arg6: memref<8x1xf32, #tpu.memory_space<vmem>>) attributes {dimension_semantics = [#tpu.dimension_semantics<parallel>], iteration_bounds = array<i64: 1>, scalar_prefetch = 0 : i64, scratch_operands = 0 : i64, tpu.core_type = #tpu.core_type<tc>, window_params = [{transform_indices = @transform_0, window_bounds = array<i64: 8, 1040>}, {pipeline_mode = #tpu.pipeline_mode<synchronous>, transform_indices = @transform_1, window_bounds = array<i64: 1040, 512>}, {pipeline_mode = #tpu.pipeline_mode<synchronous>, transform_indices = @transform_2, window_bounds = array<i64: 1, 512>}, {pipeline_mode = #tpu.pipeline_mode<synchronous>, transform_indices = @transform_3, window_bounds = array<i64: 1, 512>}, {pipeline_mode = #tpu.pipeline_mode<synchronous>, transform_indices = @transform_4, window_bounds = array<i64: 1, 1>}, {transform_indices = @transform_5, window_bounds = array<i64: 8, 1>}]} {
    %c0 = arith.constant 0 : index
    %c0_0 = arith.constant 0 : index
    %0 = vector.load %arg1[%c0, %c0_0] : memref<8x1040xf32, #tpu.memory_space<vmem>>, vector<8x1040xf32>
    %1 = arith.truncf %0 : vector<8x1040xf32> to vector<8x1040xbf16>
    %c0_1 = arith.constant 0 : index
    %c0_2 = arith.constant 0 : index
    %2 = vector.load %arg2[%c0_1, %c0_2] : memref<1040x512xbf16, #tpu.memory_space<vmem>>, vector<1040x512xbf16>
    %cst = arith.constant dense<0.000000e+00> : vector<8x512xf32>
    %3 = tpu.matmul %1, %2, %cst {dimension_numbers = #tpu.dot_dimension_numbers<[1], [0], [0], [1], [0, 0, 1, 1], [], []>} : vector<8x1040xbf16>, vector<1040x512xbf16>, vector<8x512xf32> -> vector<8x512xf32>
    %c0_3 = arith.constant 0 : index
    %c0_4 = arith.constant 0 : index
    %4 = vector.load %arg3[%c0_3, %c0_4] : memref<1x512xf32, #tpu.memory_space<vmem>>, vector<1x512xf32>
    %5 = vector.broadcast %4 : vector<1x512xf32> to vector<8x512xf32>
    %6 = arith.addf %3, %5 : vector<8x512xf32>
    %cst_5 = arith.constant 0.000000e+00 : f32
    %7 = vector.broadcast %cst_5 : f32 to vector<8x512xf32>
    %8 = arith.maximumf %6, %7 : vector<8x512xf32>
    %c0_6 = arith.constant 0 : index
    %c0_7 = arith.constant 0 : index
    %9 = vector.load %arg4[%c0_6, %c0_7] : memref<1x512xf32, #tpu.memory_space<vmem>>, vector<1x512xf32>
    %10 = vector.broadcast %9 : vector<1x512xf32> to vector<8x512xf32>
    %11 = arith.mulf %8, %10 : vector<8x512xf32>
    %cst_8 = arith.constant dense<0.000000e+00> : vector<8xf32>
    %12 = vector.multi_reduction <add>, %11, %cst_8 [1] : vector<8x512xf32> to vector<8xf32>
    %13 = vector.shape_cast %12 : vector<8xf32> to vector<8x1xf32>
    %c0_9 = arith.constant 0 : index
    %c0_10 = arith.constant 0 : index
    %14 = vector.load %arg5[%c0_9, %c0_10] : memref<1x1xf32, #tpu.memory_space<vmem>>, vector<1x1xf32>
    %15 = vector.broadcast %14 : vector<1x1xf32> to vector<8x1xf32>
    %16 = arith.addf %13, %15 : vector<8x1xf32>
    %c0_11 = arith.constant 0 : index
    %c0_12 = arith.constant 0 : index
    %17 = vector.load %arg6[%c0_11, %c0_12] : memref<8x1xf32, #tpu.memory_space<vmem>>, vector<8x1xf32>
    tpu.vector_store %arg6[%c0_11, %c0_12], %16 {strides = array<i32>} : memref<8x1xf32, #tpu.memory_space<vmem>>, vector<8x1xf32>,
    return
  }
  func.func @transform_0(%arg0: i32) -> (i32, i32) {
    %c0_i32 = arith.constant 0 : i32
    %c0_i32_0 = arith.constant 0 : i32
    return %arg0, %c0_i32 : i32, i32
  }
  func.func @transform_1(%arg0: i32) -> (i32, i32) {
    %c0_i32 = arith.constant 0 : i32
    %c0_i32_0 = arith.constant 0 : i32
    %c0_i32_1 = arith.constant 0 : i32
    return %c0_i32, %c0_i32_0 : i32, i32
  }
  func.func @transform_2(%arg0: i32) -> (i32, i32) {
    %c0_i32 = arith.constant 0 : i32
    %c0_i32_0 = arith.constant 0 : i32
    %c0_i32_1 = arith.constant 0 : i32
    return %c0_i32, %c0_i32_0 : i32, i32
  }
  func.func @transform_3(%arg0: i32) -> (i32, i32) {
    %c0_i32 = arith.constant 0 : i32
    %c0_i32_0 = arith.constant 0 : i32
    %c0_i32_1 = arith.constant 0 : i32
    return %c0_i32, %c0_i32_0 : i32, i32
  }
  func.func @transform_4(%arg0: i32) -> (i32, i32) {
    %c0_i32 = arith.constant 0 : i32
    %c0_i32_0 = arith.constant 0 : i32
    %c0_i32_1 = arith.constant 0 : i32
    return %c0_i32, %c0_i32_0 : i32, i32
  }
  func.func @transform_5(%arg0: i32) -> (i32, i32) {
    %c0_i32 = arith.constant 0 : i32
    %c0_i32_0 = arith.constant 0 : i32
    return %arg0, %c0_i32 : i32, i32
  }
}

</mosaic_0001>

<bundles_post_ra>
// kernel: tpu_custom_call.1
= control target key start
LH: loop header
LB: loop body
LE: loop exit
PB: predicated region body
PF: predicated region fallthrough
CT: control target
= control target key end

     0   :  { %s3720_s0 = inlined_call_operand.hbm [shape: f32[8,1040], index: 0, kind: input, shape index: {}]   ;;  %s3721_s1 = inlined_call_operand.hbm [shape: bf16[1040,512], index: 1, kind: input, shape index: {}]   ;;  %s3722_s2 = inlined_call_operand.hbm [shape: f32[1,512], index: 2, kind: input, shape index: {}]   ;;  %s3723_s3 = inlined_call_operand.hbm [shape: f32[1,512], index: 3, kind: input, shape index: {}]   ;;  %s3724_s4 = inlined_call_operand.<no memory space> [shape: f32[1,1], index: 4, kind: input, shape index: {}]   ;;  %s3725_s5 = inlined_call_operand.vmem [shape: f32[8,1], index: 5, kind: output, shape index: {}]  }
   0x1   :  { %v10_v0 = vstv %s3724_s4 }
   0x2   :  { %11 = vst [vmem:[#allocation2] sm:$0x1] %v10_v0 }
   0x3   :  { %12 = vsyncpa [#allocation4], 0 }
   0x4   :  { %13 = vsyncpa [#allocation6], 0  ;;  %s30_s22 = sshll.u32 %s3721_s1, 4  ;;  %s31_s22 = int_to_ptr.hbm [resolvable:$true] %s30_s22 }
   0x5   :  { %14 = vsyncpa [#allocation9], 0  ;;  %s3590_s23 = smov [#allocation5]   ;;  %s20_s27 = sshll.u32 %s3720_s0, 4  ;;  %s21_s27 = int_to_ptr.hbm [resolvable:$true] %s20_s27 }
   0x6   :  { %s32_s24 = sshll.u32 %s3590_s23, 4  ;;  %s3591_s28 = smov 256   ;;  %s33_s24 = int_to_ptr.vmem [resolvable:$true] %s32_s24 }
   0x7   :  { %s3592_s29 = smov 16   ;;  %s3593_s4 = smov [#allocation3]  }
   0x8   :  { %38 = dma.hbm_to_vmem [thread:$0]  %s31_s22, 33280, %s33_s24, [#allocation6], %s3591_s28, %s3591_s28, %s3592_s29  }
   0x9   :  { %s22_s30 = sshll.u32 %s3593_s4, 4  ;;  %s44_s8 = sshll.u32 %s3722_s2, 4  ;;  %s23_s30 = int_to_ptr.vmem [resolvable:$true] %s22_s30  ;;  %s45_s8 = int_to_ptr.hbm [resolvable:$true] %s44_s8 }
   0xa   :  { %25 = dma.hbm_to_vmem [thread:$0]  %s21_s27, 1152, %s23_s30, [#allocation4]  }
   0xb   :  { %s55_s10 = sshll.u32 %s3723_s3, 4  ;;  %s3594_s11 = smov [#allocation7]   ;;  %s56_s10 = int_to_ptr.hbm [resolvable:$true] %s55_s10 }
   0xc   :  { %s46_s12 = sshll.u32 %s3594_s11, 4  ;;  %s3595_s0 = smov [#allocation8]   ;;  %s47_s12 = int_to_ptr.vmem [resolvable:$true] %s46_s12 }
   0xd   :  { %49 = dma.hbm_to_vmem [thread:$0]  %s45_s8, 64, %s47_s12, [#allocation6]  }
   0xe   :  { %s57_s13 = sshll.u32 %s3595_s0, 4  ;;  %s58_s13 = int_to_ptr.vmem [resolvable:$true] %s57_s13 }
   0xf   :  { %60 = dma.hbm_to_vmem [thread:$0]  %s56_s10, 64, %s58_s13, [#allocation9]  }
  0x10   :  { %3584 = dma.done.wait [#allocation4], 1152  }
  0x11   :  { %3585 = vsyncadd [#allocation4], 4294966144 }
  0x12   :  { %3586 = dma.done.wait [#allocation6], 33344  }
  0x13   :  { %3587 = vsyncadd [#allocation6], 4294933952 }
  0x14   :  { %3588 = dma.done.wait [#allocation9], 64  }
  0x15   :  { %3589 = vsyncadd [#allocation9], 4294967232  ;;  %v2291_v1 = vld [vmem:[#allocation5 + $0xe0] sm:$0xf]  ;;  %v3251_v2 = vld [vmem:[#allocation5 + $0xec] sm:$0xf0] }
  0x16   :  { %v2419_v3 = vld [vmem:[#allocation5 + $0x1e0] sm:$0xf]  ;;  %v2292_v4 = vor.u32 %v3251_v2, %v2291_v1  ;;  %v3283_v5 = vld [vmem:[#allocation5 + $0x1ec] sm:$0xf0]  ;;  %vm1668_vm0 = vcmask 130048   ;;  %vm2168_vm1 = vcmask 7168  }
  0x17   :  { %v2547_v6 = vld [vmem:[#allocation5 + $0x2e0] sm:$0xf]  ;;  %v3315_v7 = vld [vmem:[#allocation5 + $0x2ec] sm:$0xf0]  ;;  %v2420_v8 = vor.u32 %v3283_v5, %v2419_v3 }
  0x18   :  { %v2548_v9 = vor.u32 %v3315_v7, %v2547_v6  ;;  %v2675_v10 = vld [vmem:[#allocation5 + $0x3e0] sm:$0xf]  ;;  %v3347_v11 = vld [vmem:[#allocation5 + $0x3ec] sm:$0xf0]  ;;  %1672 = vmatpush.bf16.msra.mxu0 %v2292_v4 }
  0x19   :  { %v2275_v12 = vld [vmem:[#allocation5 + $0xc0] sm:$0xf]  ;;  %v2676_v13 = vor.u32 %v3347_v11, %v2675_v10  ;;  %v3247_v14 = vld [vmem:[#allocation5 + $0xcc] sm:$0xf0]  ;;  %1685 = vmatpush.bf16.msra.mxu1 %v2420_v8 }
  0x1a   :  { %v2403_v15 = vld [vmem:[#allocation5 + $0x1c0] sm:$0xf]  ;;  %v3279_v16 = vld [vmem:[#allocation5 + $0x1cc] sm:$0xf0]  ;;  %1698 = vmatpush.bf16.msra.mxu2 %v2548_v9  ;;  %v2276_v17 = vor.u32 %v3247_v14, %v2275_v12 }
  0x1b   :  { %v2404_v18 = vor.u32 %v3279_v16, %v2403_v15  ;;  %v2531_v19 = vld [vmem:[#allocation5 + $0x2c0] sm:$0xf]  ;;  %v3311_v20 = vld [vmem:[#allocation5 + $0x2cc] sm:$0xf0]  ;;  %1711 = vmatpush.bf16.msra.mxu3 %v2676_v13 }
  0x1c   :  { %v2659_v21 = vld [vmem:[#allocation5 + $0x3c0] sm:$0xf]  ;;  %v2532_v22 = vor.u32 %v3311_v20, %v2531_v19  ;;  %v3343_v23 = vld [vmem:[#allocation5 + $0x3cc] sm:$0xf0]  ;;  %1673 = vmatpush.bf16.msra.mxu0 %v2276_v17 }
  0x1d   :  { %v2259_v24 = vld [vmem:[#allocation5 + $0xa0] sm:$0xf]  ;;  %v3243_v25 = vld [vmem:[#allocation5 + $0xac] sm:$0xf0]  ;;  %v2660_v26 = vor.u32 %v3343_v23, %v2659_v21  ;;  %1686 = vmatpush.bf16.msra.mxu1 %v2404_v18 }
  0x1e   :  { %v2387_v27 = vld [vmem:[#allocation5 + $0x1a0] sm:$0xf]  ;;  %v3275_v28 = vld [vmem:[#allocation5 + $0x1ac] sm:$0xf0]  ;;  %v2260_v30 = vor.u32 %v3243_v25, %v2259_v24  ;;  %1699 = vmatpush.bf16.msra.mxu2 %v2532_v22 }
  0x1f   :  { %v2515_v29 = vld [vmem:[#allocation5 + $0x2a0] sm:$0xf]  ;;  %v3307_v31 = vld [vmem:[#allocation5 + $0x2ac] sm:$0xf0]  ;;  %v2388_v34 = vor.u32 %v3275_v28, %v2387_v27  ;;  %1712 = vmatpush.bf16.msra.mxu3 %v2660_v26 }
  0x20   :  { %v2643_v32 = vld [vmem:[#allocation5 + $0x3a0] sm:$0xf]  ;;  %v3339_v33 = vld [vmem:[#allocation5 + $0x3ac] sm:$0xf0]  ;;  %v2516_v35 = vor.u32 %v3307_v31, %v2515_v29  ;;  %1674 = vmatpush.bf16.msra.mxu0 %v2260_v30 }
  0x21   :  { %v2243_v36 = vld [vmem:[#allocation5 + $0x80] sm:$0xf]  ;;  %v3239_v37 = vld [vmem:[#allocation5 + $0x8c] sm:$0xf0]  ;;  %v2644_v39 = vor.u32 %v3339_v33, %v2643_v32  ;;  %1687 = vmatpush.bf16.msra.mxu1 %v2388_v34 }
  0x22   :  { %v2371_v38 = vld [vmem:[#allocation5 + $0x180] sm:$0xf]  ;;  %v3271_v40 = vld [vmem:[#allocation5 + $0x18c] sm:$0xf0]  ;;  %v2244_v45 = vor.u32 %v3239_v37, %v2243_v36  ;;  %1700 = vmatpush.bf16.msra.mxu2 %v2516_v35 }
  0x23   :  { %v2499_v41 = vld [vmem:[#allocation5 + $0x280] sm:$0xf]  ;;  %v3303_v42 = vld [vmem:[#allocation5 + $0x28c] sm:$0xf0]  ;;  %v2372_v46 = vor.u32 %v3271_v40, %v2371_v38  ;;  %1713 = vmatpush.bf16.msra.mxu3 %v2644_v39 }
  0x24   :  { %v2627_v43 = vld [vmem:[#allocation5 + $0x380] sm:$0xf]  ;;  %v3335_v44 = vld [vmem:[#allocation5 + $0x38c] sm:$0xf0]  ;;  %v2500_v47 = vor.u32 %v3303_v42, %v2499_v41  ;;  %1675 = vmatpush.bf16.msra.mxu0 %v2244_v45 }
  0x25   :  { %v2227_v48 = vld [vmem:[#allocation5 + $0x60] sm:$0xf]  ;;  %v3235_v49 = vld [vmem:[#allocation5 + $0x6c] sm:$0xf0]  ;;  %v2628_v51 = vor.u32 %v3335_v44, %v2627_v43  ;;  %1688 = vmatpush.bf16.msra.mxu1 %v2372_v46 }
  0x26   :  { %v2355_v50 = vld [vmem:[#allocation5 + $0x160] sm:$0xf]  ;;  %v3267_v52 = vld [vmem:[#allocation5 + $0x16c] sm:$0xf0]  ;;  %v2228_v57 = vor.u32 %v3235_v49, %v2227_v48  ;;  %1701 = vmatpush.bf16.msra.mxu2 %v2500_v47 }
  0x27   :  { %v2483_v53 = vld [vmem:[#allocation5 + $0x260] sm:$0xf]  ;;  %v3299_v54 = vld [vmem:[#allocation5 + $0x26c] sm:$0xf0]  ;;  %v2356_v58 = vor.u32 %v3267_v52, %v2355_v50  ;;  %1714 = vmatpush.bf16.msra.mxu3 %v2628_v51 }
  0x28   :  { %v2611_v55 = vld [vmem:[#allocation5 + $0x360] sm:$0xf]  ;;  %v3331_v56 = vld [vmem:[#allocation5 + $0x36c] sm:$0xf0]  ;;  %v2484_v59 = vor.u32 %v3299_v54, %v2483_v53  ;;  %1676 = vmatpush.bf16.msra.mxu0 %v2228_v57  ;;  %v80_v53 = vld [vmem:[#allocation3] sm:$0xff] }
  0x29   :  { %v2211_v60 = vld [vmem:[#allocation5 + $0x40] sm:$0xf]  ;;  %v3231_v61 = vld [vmem:[#allocation5 + $0x4c] sm:$0xf0]  ;;  %v2612_v63 = vor.u32 %v3331_v56, %v2611_v55  ;;  %1689 = vmatpush.bf16.msra.mxu1 %v2356_v58  ;;  %v3641_v56 = vpack.c.bf16 %v80_v53, %v80_v53 }
  0x2a   :  { %v2339_v62 = vld [vmem:[#allocation5 + $0x140] sm:$0xf]  ;;  %v3263_v0 = vld [vmem:[#allocation5 + $0x14c] sm:$0xf0]  ;;  %v2212_v5 = vor.u32 %v3231_v61, %v2211_v60  ;;  %1702 = vmatpush.bf16.msra.mxu2 %v2484_v59 }
  0x2b   :  { %v2467_v1 = vld [vmem:[#allocation5 + $0x240] sm:$0xf]  ;;  %v3295_v2 = vld [vmem:[#allocation5 + $0x24c] sm:$0xf0]  ;;  %v2340_v6 = vor.u32 %v3263_v0, %v2339_v62  ;;  %1715 = vmatpush.bf16.msra.mxu3 %v2612_v63 }
  0x2c   :  { %v2595_v3 = vld [vmem:[#allocation5 + $0x340] sm:$0xf]  ;;  %v3327_v4 = vld [vmem:[#allocation5 + $0x34c] sm:$0xf0]  ;;  %v2468_v7 = vor.u32 %v3295_v2, %v2467_v1  ;;  %1677 = vmatpush.bf16.msra.mxu0 %v2212_v5  ;;  %v82_v1 = vld [vmem:[#allocation3 + $0x10] sm:$0xff] }
  0x2d   :  { %v2195_v8 = vld [vmem:[#allocation5 + $0x20] sm:$0xf]  ;;  %v3227_v9 = vld [vmem:[#allocation5 + $0x2c] sm:$0xf0]  ;;  %v2596_v11 = vor.u32 %v3327_v4, %v2595_v3  ;;  %1690 = vmatpush.bf16.msra.mxu1 %v2340_v6  ;;  %v3644_v4 = vpack.c.bf16 %v82_v1, %v82_v1 }
  0x2e   :  { %v2323_v10 = vld [vmem:[#allocation5 + $0x120] sm:$0xf]  ;;  %v3259_v12 = vld [vmem:[#allocation5 + $0x12c] sm:$0xf0]  ;;  %v2196_v17 = vor.u32 %v3227_v9, %v2195_v8  ;;  %1703 = vmatpush.bf16.msra.mxu2 %v2468_v7 }
  0x2f   :  { %v2451_v13 = vld [vmem:[#allocation5 + $0x220] sm:$0xf]  ;;  %v3291_v14 = vld [vmem:[#allocation5 + $0x22c] sm:$0xf0]  ;;  %v2324_v20 = vor.u32 %v3259_v12, %v2323_v10  ;;  %1716 = vmatpush.bf16.msra.mxu3 %v2596_v11 }
  0x30   :  { %v2579_v15 = vld [vmem:[#allocation5 + $0x320] sm:$0xf]  ;;  %v3323_v16 = vld [vmem:[#allocation5 + $0x32c] sm:$0xf0]  ;;  %v2452_v21 = vor.u32 %v3291_v14, %v2451_v13  ;;  %1678 = vmatpush.bf16.msra.mxu0 %v2196_v17 }
  0x31   :  { %v2179_v18 = vld [vmem:[#allocation5] sm:$0xf]  ;;  %v3223_v19 = vld [vmem:[#allocation5 + $0xc] sm:$0xf0]  ;;  %v2580_v25 = vor.u32 %v3323_v16, %v2579_v15  ;;  %1691 = vmatpush.bf16.msra.mxu1 %v2324_v20 }
  0x32   :  { %v2307_v22 = vld [vmem:[#allocation5 + $0x100] sm:$0xf]  ;;  %v3255_v23 = vld [vmem:[#allocation5 + $0x10c] sm:$0xf0]  ;;  %v2180_v32 = vor.u32 %v3223_v19, %v2179_v18  ;;  %1704 = vmatpush.bf16.msra.mxu2 %v2452_v21 }
  0x33   :  { %v2435_v24 = vld [vmem:[#allocation5 + $0x200] sm:$0xf]  ;;  %v3287_v26 = vld [vmem:[#allocation5 + $0x20c] sm:$0xf0]  ;;  %v2308_v36 = vor.u32 %v3255_v23, %v2307_v22  ;;  %1717 = vmatpush.bf16.msra.mxu3 %v2580_v25 }
  0x34   :  { %v2563_v27 = vld [vmem:[#allocation5 + $0x300] sm:$0xf]  ;;  %v3319_v28 = vld [vmem:[#allocation5 + $0x30c] sm:$0xf0]  ;;  %v2436_v37 = vor.u32 %v3287_v26, %v2435_v24  ;;  %1679 = vmatpush.bf16.msra.mxu0 %v2180_v32 }
  0x35   :  { %v2803_v29 = vld [vmem:[#allocation5 + $0x4e0] sm:$0xf]  ;;  %v3379_v30 = vld [vmem:[#allocation5 + $0x4ec] sm:$0xf0]  ;;  %v2564_v40 = vor.u32 %v3319_v28, %v2563_v27  ;;  %1692 = vmatpush.bf16.msra.mxu1 %v2308_v36 }
  0x36   :  { %v2931_v31 = vld [vmem:[#allocation5 + $0x5e0] sm:$0xf]  ;;  %v3411_v33 = vld [vmem:[#allocation5 + $0x5ec] sm:$0xf0]  ;;  %v2804_v41 = vor.u32 %v3379_v30, %v2803_v29  ;;  %1705 = vmatpush.bf16.msra.mxu2 %v2436_v37 }
  0x37   :  { %v3059_v34 = vld [vmem:[#allocation5 + $0x6e0] sm:$0xf]  ;;  %v3443_v35 = vld [vmem:[#allocation5 + $0x6ec] sm:$0xf0]  ;;  %v2932_v42 = vor.u32 %v3411_v33, %v2931_v31  ;;  %1718 = vmatpush.bf16.msra.mxu3 %v2564_v40  ;;  %1680 = vmatmul.bf16.vlgmr.msra.gmra.mxu0 %v3641_v56 }
  0x38   :  { %v3187_v38 = vld [vmem:[#allocation5 + $0x7e0] sm:$0xf]  ;;  %v3475_v39 = vld [vmem:[#allocation5 + $0x7ec] sm:$0xf0]  ;;  %v3060_v43 = vor.u32 %v3443_v35, %v3059_v34  ;;  %1724 = vmatpush.bf16.msrb.mxu0 %v2804_v41 }
  0x39   :  { %v2787_v44 = vld [vmem:[#allocation5 + $0x4c0] sm:$0xf]  ;;  %v3375_v45 = vld [vmem:[#allocation5 + $0x4cc] sm:$0xf0]  ;;  %v3188_v47 = vor.u32 %v3475_v39, %v3187_v38  ;;  %1737 = vmatpush.bf16.msrb.mxu1 %v2932_v42  ;;  %1706 = vmatmul.bf16.vlgmr.msra.gmra.mxu2 %v3644_v4 }
  0x3a   :  { %v2915_v46 = vld [vmem:[#allocation5 + $0x5c0] sm:$0xf]  ;;  %v3407_v48 = vld [vmem:[#allocation5 + $0x5cc] sm:$0xf0]  ;;  %v2788_v54 = vor.u32 %v3375_v45, %v2787_v44  ;;  %1750 = vmatpush.bf16.msrb.mxu2 %v3060_v43 }
  0x3b   :  { %v3043_v49 = vld [vmem:[#allocation5 + $0x6c0] sm:$0xf]  ;;  %v3439_v50 = vld [vmem:[#allocation5 + $0x6cc] sm:$0xf0]  ;;  %v2916_v57 = vor.u32 %v3407_v48, %v2915_v46  ;;  %1763 = vmatpush.bf16.msrb.mxu3 %v3188_v47 }
  0x3c   :  { %v3171_v51 = vld [vmem:[#allocation5 + $0x7c0] sm:$0xf]  ;;  %v3471_v52 = vld [vmem:[#allocation5 + $0x7cc] sm:$0xf0]  ;;  %v3044_v58 = vor.u32 %v3439_v50, %v3043_v49  ;;  %1725 = vmatpush.bf16.msrb.mxu0 %v2788_v54 }
  0x3d   :  { %v2771_v55 = vld [vmem:[#allocation5 + $0x4a0] sm:$0xf]  ;;  %v3371_v59 = vld [vmem:[#allocation5 + $0x4ac] sm:$0xf0]  ;;  %v3172_v62 = vor.u32 %v3471_v52, %v3171_v51  ;;  %1738 = vmatpush.bf16.msrb.mxu1 %v2916_v57 }
  0x3e   :  { %v2899_v60 = vld [vmem:[#allocation5 + $0x5a0] sm:$0xf]  ;;  %v3403_v61 = vld [vmem:[#allocation5 + $0x5ac] sm:$0xf0]  ;;  %v2772_v5 = vor.u32 %v3371_v59, %v2771_v55  ;;  %1751 = vmatpush.bf16.msrb.mxu2 %v3044_v58 }
  0x3f   :  { %v3027_v63 = vld [vmem:[#allocation5 + $0x6a0] sm:$0xf]  ;;  %v3435_v0 = vld [vmem:[#allocation5 + $0x6ac] sm:$0xf0]  ;;  %v2900_v8 = vor.u32 %v3403_v61, %v2899_v60  ;;  %1764 = vmatpush.bf16.msrb.mxu3 %v3172_v62 }
  0x40   :  { %v3155_v2 = vld [vmem:[#allocation5 + $0x7a0] sm:$0xf]  ;;  %v3467_v3 = vld [vmem:[#allocation5 + $0x7ac] sm:$0xf0]  ;;  %v3028_v9 = vor.u32 %v3435_v0, %v3027_v63  ;;  %1726 = vmatpush.bf16.msrb.mxu0 %v2772_v5 }
  0x41   :  { %v2755_v6 = vld [vmem:[#allocation5 + $0x480] sm:$0xf]  ;;  %v3367_v7 = vld [vmem:[#allocation5 + $0x48c] sm:$0xf0]  ;;  %v3156_v13 = vor.u32 %v3467_v3, %v3155_v2  ;;  %1739 = vmatpush.bf16.msrb.mxu1 %v2900_v8  ;;  %v2293_v8 = vld [vmem:[#allocation5 + $0xf0] sm:$0xf0] }
  0x42   :  { %v2883_v10 = vld [vmem:[#allocation5 + $0x580] sm:$0xf]  ;;  %v83_v11 = vld [vmem:[#allocation3 + $0x18] sm:$0xff]  ;;  %v2756_v21 = vor.u32 %v3367_v7, %v2755_v6  ;;  %1752 = vmatpush.bf16.msrb.mxu2 %v3028_v9  ;;  %v3249_v7 = vld [vmem:[#allocation5 + $0xe4] sm:$0xf] }
  0x43   :  { %v81_v12 = vld [vmem:[#allocation3 + $0x8] sm:$0xff]  ;;  %v3399_v14 = vld [vmem:[#allocation5 + $0x58c] sm:$0xf0]  ;;  %v3647_v17 = vpack.c.bf16 %v83_v11, %v83_v11  ;;  %1765 = vmatpush.bf16.msrb.mxu3 %v3156_v13  ;;  %v2549_v13 = vld [vmem:[#allocation5 + $0x2f0] sm:$0xf0] }
  0x44   :  { %v3011_v15 = vld [vmem:[#allocation5 + $0x680] sm:$0xf]  ;;  %v3431_v16 = vld [vmem:[#allocation5 + $0x68c] sm:$0xf0]  ;;  %v3649_v18 = vpack.c.bf16 %v81_v12, %v81_v12  ;;  %v2884_v22 = vor.u32 %v3399_v14, %v2883_v10  ;;  %1727 = vmatpush.bf16.msrb.mxu0 %v2756_v21  ;;  %v3281_v9 = vld [vmem:[#allocation5 + $0x1e4] sm:$0xf] }
  0x45   :  { %v3139_v19 = vld [vmem:[#allocation5 + $0x780] sm:$0xf]  ;;  %v3463_v20 = vld [vmem:[#allocation5 + $0x78c] sm:$0xf0]  ;;  %1719 = vmatmul.bf16.vlgmr.msra.gmra.mxu3 %v3647_v17  ;;  %v3012_v23 = vor.u32 %v3431_v16, %v3011_v15  ;;  %v2421_v10 = vld [vmem:[#allocation5 + $0x1f0] sm:$0xf0] }
  0x46   :  { %v2739_v24 = vld [vmem:[#allocation5 + $0x460] sm:$0xf]  ;;  %v3363_v25 = vld [vmem:[#allocation5 + $0x46c] sm:$0xf0]  ;;  %v3140_v27 = vor.u32 %v3463_v20, %v3139_v19  ;;  %1693 = vmatmul.bf16.vlgmr.msra.gmra.mxu1 %v3649_v18  ;;  %v3313_v12 = vld [vmem:[#allocation5 + $0x2e4] sm:$0xf] }
  0x47   :  { %v2867_v26 = vld [vmem:[#allocation5 + $0x560] sm:$0xf]  ;;  %v3395_v28 = vld [vmem:[#allocation5 + $0x56c] sm:$0xf0]  ;;  %v2740_v33 = vor.u32 %v3363_v25, %v2739_v24  ;;  %1740 = vmatpush.bf16.msrb.mxu1 %v2884_v22  ;;  %1753 = vmatpush.bf16.msrb.mxu2 %v3012_v23  ;;  %v84_v14 = vld [vmem:[#allocation3 + $0x20] sm:$0xff]  ;;  %v2296_v23 = vor.u32 %v3249_v7, %v2293_v8 }
  0x48   :  { %v2995_v29 = vld [vmem:[#allocation5 + $0x660] sm:$0xf]  ;;  %v3427_v30 = vld [vmem:[#allocation5 + $0x66c] sm:$0xf0]  ;;  %v2868_v34 = vor.u32 %v3395_v28, %v2867_v26  ;;  %1766 = vmatpush.bf16.msrb.mxu3 %v3140_v27  ;;  %v3245_v19 = vld [vmem:[#allocation5 + $0xc4] sm:$0xf]  ;;  %v2424_v27 = vor.u32 %v3281_v9, %v2421_v10  ;;  %v2552_v28 = vor.u32 %v3313_v12, %v2549_v13 }
  0x49   :  { %v3123_v31 = vld [vmem:[#allocation5 + $0x760] sm:$0xf]  ;;  %v3459_v32 = vld [vmem:[#allocation5 + $0x76c] sm:$0xf0]  ;;  %v2996_v35 = vor.u32 %v3427_v30, %v2995_v29  ;;  %1728 = vmatpush.bf16.msrb.mxu0 %v2740_v33  ;;  %v2277_v20 = vld [vmem:[#allocation5 + $0xd0] sm:$0xf0] }
  0x4a   :  { %v2723_v36 = vld [vmem:[#allocation5 + $0x440] sm:$0xf]  ;;  %v3359_v37 = vld [vmem:[#allocation5 + $0x44c] sm:$0xf0]  ;;  %v3124_v39 = vor.u32 %v3459_v32, %v3123_v31  ;;  %v86_v21 = vld [vmem:[#allocation3 + $0x30] sm:$0xff]  ;;  %v3653_v32 = vpack.c.bf16 %v84_v14, %v84_v14 }
  0x4b   :  { %v2851_v38 = vld [vmem:[#allocation5 + $0x540] sm:$0xf]  ;;  %v3391_v40 = vld [vmem:[#allocation5 + $0x54c] sm:$0xf0]  ;;  %v2724_v45 = vor.u32 %v3359_v37, %v2723_v36  ;;  %1741 = vmatpush.bf16.msrb.mxu1 %v2868_v34  ;;  %1754 = vmatpush.bf16.msrb.mxu2 %v2996_v35  ;;  %v3277_v29 = vld [vmem:[#allocation5 + $0x1c4] sm:$0xf]  ;;  %v3655_v36 = vpack.c.bf16 %v86_v21, %v86_v21 }
  0x4c   :  { %v2979_v41 = vld [vmem:[#allocation5 + $0x640] sm:$0xf]  ;;  %v3423_v42 = vld [vmem:[#allocation5 + $0x64c] sm:$0xf0]  ;;  %v2852_v46 = vor.u32 %v3391_v40, %v2851_v38  ;;  %1767 = vmatpush.bf16.msrb.mxu3 %v3124_v39  ;;  %v3345_v30 = vld [vmem:[#allocation5 + $0x3e4] sm:$0xf]  ;;  %v2280_v40 = vor.u32 %v3245_v19, %v2277_v20 }
  0x4d   :  { %v3107_v43 = vld [vmem:[#allocation5 + $0x740] sm:$0xf]  ;;  %v3455_v44 = vld [vmem:[#allocation5 + $0x74c] sm:$0xf0]  ;;  %v2980_v47 = vor.u32 %v3423_v42, %v2979_v41  ;;  %1729 = vmatpush.bf16.msrb.mxu0 %v2724_v45  ;;  %v2677_v31 = vld [vmem:[#allocation5 + $0x3f0] sm:$0xf0] }
  0x4e   :  { %v2707_v48 = vld [vmem:[#allocation5 + $0x420] sm:$0xf]  ;;  %v3355_v49 = vld [vmem:[#allocation5 + $0x42c] sm:$0xf0]  ;;  %v3108_v51 = vor.u32 %v3455_v44, %v3107_v43  ;;  %v2405_v33 = vld [vmem:[#allocation5 + $0x1d0] sm:$0xf0]  ;;  %v2680_v43 = vor.u32 %v3345_v30, %v2677_v31 }
  0x4f   :  { %v2835_v50 = vld [vmem:[#allocation5 + $0x520] sm:$0xf]  ;;  %v3387_v52 = vld [vmem:[#allocation5 + $0x52c] sm:$0xf0]  ;;  %v2708_v58 = vor.u32 %v3355_v49, %v2707_v48  ;;  %1742 = vmatpush.bf16.msrb.mxu1 %v2852_v46  ;;  %1755 = vmatpush.bf16.msrb.mxu2 %v2980_v47  ;;  %v3309_v34 = vld [vmem:[#allocation5 + $0x2c4] sm:$0xf]  ;;  %v2408_v44 = vor.u32 %v3277_v29, %v2405_v33 }
  0x50   :  { %v2963_v53 = vld [vmem:[#allocation5 + $0x620] sm:$0xf]  ;;  %v3419_v54 = vld [vmem:[#allocation5 + $0x62c] sm:$0xf0]  ;;  %v2836_v62 = vor.u32 %v3387_v52, %v2835_v50  ;;  %1768 = vmatpush.bf16.msrb.mxu3 %v3108_v51  ;;  %v2533_v35 = vld [vmem:[#allocation5 + $0x2d0] sm:$0xf0] }
  0x51   :  { %v3091_v55 = vld [vmem:[#allocation5 + $0x720] sm:$0xf]  ;;  %v3451_v57 = vld [vmem:[#allocation5 + $0x72c] sm:$0xf0]  ;;  %v2964_v63 = vor.u32 %v3419_v54, %v2963_v53  ;;  %1730 = vmatpush.bf16.msrb.mxu0 %v2708_v58  ;;  %v3241_v41 = vld [vmem:[#allocation5 + $0xa4] sm:$0xf]  ;;  %v2536_v45 = vor.u32 %v3309_v34, %v2533_v35 }
  0x52   :  { %v2691_v59 = vld [vmem:[#allocation5 + $0x400] sm:$0xf]  ;;  %v3351_v60 = vld [vmem:[#allocation5 + $0x40c] sm:$0xf0]  ;;  %v3092_v3 = vor.u32 %v3451_v57, %v3091_v55  ;;  %v2261_v42 = vld [vmem:[#allocation5 + $0xb0] sm:$0xf0] }
  0x53   :  { %v2819_v61 = vld [vmem:[#allocation5 + $0x500] sm:$0xf]  ;;  %v3383_v0 = vld [vmem:[#allocation5 + $0x50c] sm:$0xf0]  ;;  %v2692_v11 = vor.u32 %v3351_v60, %v2691_v59  ;;  %1743 = vmatpush.bf16.msrb.mxu1 %v2836_v62  ;;  %1756 = vmatpush.bf16.msrb.mxu2 %v2964_v63  ;;  %v3273_v46 = vld [vmem:[#allocation5 + $0x1a4] sm:$0xf]  ;;  %v2264_v53 = vor.u32 %v3241_v41, %v2261_v42 }
  0x54   :  { %v2947_v1 = vld [vmem:[#allocation5 + $0x600] sm:$0xf]  ;;  %v3415_v2 = vld [vmem:[#allocation5 + $0x60c] sm:$0xf0]  ;;  %v2820_v15 = vor.u32 %v3383_v0, %v2819_v61  ;;  %1769 = vmatpush.bf16.msrb.mxu3 %v3092_v3  ;;  %v3341_v47 = vld [vmem:[#allocation5 + $0x3c4] sm:$0xf] }
  0x55   :  { %v3075_v5 = vld [vmem:[#allocation5 + $0x700] sm:$0xf]  ;;  %v3447_v6 = vld [vmem:[#allocation5 + $0x70c] sm:$0xf0]  ;;  %v2948_v16 = vor.u32 %v3415_v2, %v2947_v1  ;;  %1731 = vmatpush.bf16.msrb.mxu0 %v2692_v11  ;;  %v2661_v48 = vld [vmem:[#allocation5 + $0x3d0] sm:$0xf0] }
  0x56   :  { %v3076_v22 = vor.u32 %v3447_v6, %v3075_v5  ;;  %v3203_v24 = vld [vmem:[#allocation5 + $0x800] sm:$0xf]  ;;  %v3479_v25 = vld [vmem:[#allocation5 + $0x80c] sm:$0xf0]  ;;  %v2389_v49 = vld [vmem:[#allocation5 + $0x1b0] sm:$0xf0]  ;;  %v2664_v57 = vor.u32 %v3341_v47, %v2661_v48 }
  0x57   :  { %v87_v26 = vld [vmem:[#allocation3 + $0x38] sm:$0xff]  ;;  %1744 = vmatpush.bf16.msrb.mxu1 %v2820_v15  ;;  %1757 = vmatpush.bf16.msrb.mxu2 %v2948_v16  ;;  %v3204_v37 = vor.u32 %v3479_v25, %v3203_v24  ;;  %v85_v39 = vld [vmem:[#allocation3 + $0x28] sm:$0xff]  ;;  %v2392_v58 = vor.u32 %v3273_v46, %v2389_v49  ;;  %v88_v15 = vld [vmem:[#allocation3 + $0x40] sm:$0xff] }
  0x58   :  { %v3657_v38 = vpack.c.bf16 %v87_v26, %v87_v26  ;;  %1770 = vmatpush.bf16.msrb.mxu3 %v3076_v22  ;;  %1732 = vmatmul.bf16.vlgmr.msrb.gmra.mxu0 %v3653_v32  ;;  %v3305_v50 = vld [vmem:[#allocation5 + $0x2a4] sm:$0xf]  ;;  %v2517_v51 = vld [vmem:[#allocation5 + $0x2b0] sm:$0xf0]  ;;  %v3661_v52 = vpack.c.bf16 %v85_v39, %v85_v39 }
  0x59   :  { %1783 = vmatpush.bf16.msra.mxu0 %v3204_v37  ;;  %v3237_v54 = vld [vmem:[#allocation5 + $0x84] sm:$0xf]  ;;  %v2245_v55 = vld [vmem:[#allocation5 + $0x90] sm:$0xf0]  ;;  %v2520_v59 = vor.u32 %v3305_v50, %v2517_v51 }
  0x5a   :  { %1758 = vmatmul.bf16.vlgmr.msrb.gmra.mxu2 %v3655_v36  ;;  %v3269_v60 = vld [vmem:[#allocation5 + $0x184] sm:$0xf]  ;;  %v2645_v62 = vld [vmem:[#allocation5 + $0x3b0] sm:$0xf0]  ;;  %1745 = vmatmul.bf16.vlgmr.msrb.gmra.mxu1 %v3661_v52  ;;  %v2248_v2 = vor.u32 %v3237_v54, %v2245_v55 }
  0x5b   :  { %1789 = vmatpush.bf16.msra.mxu1 %v2296_v23  ;;  %1802 = vmatpush.bf16.msra.mxu2 %v2424_v27  ;;  %v3337_v61 = vld [vmem:[#allocation5 + $0x3a4] sm:$0xf]  ;;  %v2373_v63 = vld [vmem:[#allocation5 + $0x190] sm:$0xf0]  ;;  %v3665_v27 = vpack.c.bf16 %v88_v15, %v88_v15 }
  0x5c   :  { %1815 = vmatpush.bf16.msra.mxu3 %v2552_v28  ;;  %v3301_v0 = vld [vmem:[#allocation5 + $0x284] sm:$0xf]  ;;  %v2501_v1 = vld [vmem:[#allocation5 + $0x290] sm:$0xf0]  ;;  %v2648_v6 = vor.u32 %v3337_v61, %v2645_v62  ;;  %v2376_v7 = vor.u32 %v3269_v60, %v2373_v63 }
  0x5d   :  { %1771 = vmatmul.bf16.vlgmr.msrb.gmra.mxu3 %v3657_v38  ;;  %1828 = vmatpush.bf16.msrb.mxu0 %v2680_v43  ;;  %v3233_v3 = vld [vmem:[#allocation5 + $0x64] sm:$0xf]  ;;  %v2229_v5 = vld [vmem:[#allocation5 + $0x70] sm:$0xf0]  ;;  %v2504_v8 = vor.u32 %v3301_v0, %v2501_v1 }
  0x5e   :  { %v3265_v9 = vld [vmem:[#allocation5 + $0x164] sm:$0xf]  ;;  %v2629_v11 = vld [vmem:[#allocation5 + $0x390] sm:$0xf0]  ;;  %v2232_v16 = vor.u32 %v3233_v3, %v2229_v5 }
  0x5f   :  { %1790 = vmatpush.bf16.msra.mxu1 %v2280_v40  ;;  %1803 = vmatpush.bf16.msra.mxu2 %v2408_v44  ;;  %v3333_v10 = vld [vmem:[#allocation5 + $0x384] sm:$0xf]  ;;  %v2357_v12 = vld [vmem:[#allocation5 + $0x170] sm:$0xf0] }
  0x60   :  { %1816 = vmatpush.bf16.msra.mxu3 %v2536_v45  ;;  %v3297_v13 = vld [vmem:[#allocation5 + $0x264] sm:$0xf]  ;;  %v2485_v14 = vld [vmem:[#allocation5 + $0x270] sm:$0xf0]  ;;  %v2632_v21 = vor.u32 %v3333_v10, %v2629_v11  ;;  %v2360_v22 = vor.u32 %v3265_v9, %v2357_v12 }
  0x61   :  { %1829 = vmatpush.bf16.msrb.mxu0 %v2664_v57  ;;  %v3229_v19 = vld [vmem:[#allocation5 + $0x44] sm:$0xf]  ;;  %v2213_v20 = vld [vmem:[#allocation5 + $0x50] sm:$0xf0]  ;;  %v2488_v23 = vor.u32 %v3297_v13, %v2485_v14 }
  0x62   :  { %v3261_v24 = vld [vmem:[#allocation5 + $0x144] sm:$0xf]  ;;  %v2613_v26 = vld [vmem:[#allocation5 + $0x370] sm:$0xf0]  ;;  %v2216_v31 = vor.u32 %v3229_v19, %v2213_v20 }
  0x63   :  { %1791 = vmatpush.bf16.msra.mxu1 %v2264_v53  ;;  %1804 = vmatpush.bf16.msra.mxu2 %v2392_v58  ;;  %v3329_v25 = vld [vmem:[#allocation5 + $0x364] sm:$0xf]  ;;  %v2341_v28 = vld [vmem:[#allocation5 + $0x150] sm:$0xf0] }
  0x64   :  { %1817 = vmatpush.bf16.msra.mxu3 %v2520_v59  ;;  %v3293_v29 = vld [vmem:[#allocation5 + $0x244] sm:$0xf]  ;;  %v2469_v30 = vld [vmem:[#allocation5 + $0x250] sm:$0xf0]  ;;  %v2616_v35 = vor.u32 %v3329_v25, %v2613_v26  ;;  %v2344_v37 = vor.u32 %v3261_v24, %v2341_v28 }
  0x65   :  { %1830 = vmatpush.bf16.msrb.mxu0 %v2648_v6  ;;  %v3225_v33 = vld [vmem:[#allocation5 + $0x24] sm:$0xf]  ;;  %v2197_v34 = vld [vmem:[#allocation5 + $0x30] sm:$0xf0]  ;;  %v2472_v39 = vor.u32 %v3293_v29, %v2469_v30 }
  0x66   :  { %v3257_v40 = vld [vmem:[#allocation5 + $0x124] sm:$0xf]  ;;  %v2597_v42 = vld [vmem:[#allocation5 + $0x350] sm:$0xf0]  ;;  %v2200_v47 = vor.u32 %v3225_v33, %v2197_v34 }
  0x67   :  { %1792 = vmatpush.bf16.msra.mxu1 %v2248_v2  ;;  %1805 = vmatpush.bf16.msra.mxu2 %v2376_v7  ;;  %v3325_v41 = vld [vmem:[#allocation5 + $0x344] sm:$0xf]  ;;  %v2325_v43 = vld [vmem:[#allocation5 + $0x130] sm:$0xf0] }
  0x68   :  { %1818 = vmatpush.bf16.msra.mxu3 %v2504_v8  ;;  %3217 = vmatmul.msk.bf16.vlgmr.msra.gmra.mxu0 %vm1668_vm0, %v3665_v27  ;;  %v3289_v44 = vld [vmem:[#allocation5 + $0x224] sm:$0xf]  ;;  %v2453_v45 = vld [vmem:[#allocation5 + $0x230] sm:$0xf0]  ;;  %v2600_v51 = vor.u32 %v3325_v41, %v2597_v42  ;;  %v2328_v53 = vor.u32 %v3257_v40, %v2325_v43 }
  0x69   :  { %1831 = vmatpush.bf16.msrb.mxu0 %v2632_v21  ;;  %v3221_v46 = vld [vmem:[#allocation5 + $0x4] sm:$0xf]  ;;  %v2181_v48 = vld [vmem:[#allocation5 + $0x10] sm:$0xf0]  ;;  %v2456_v54 = vor.u32 %v3289_v44, %v2453_v45 }
  0x6a   :  { %v3253_v49 = vld [vmem:[#allocation5 + $0x104] sm:$0xf]  ;;  %v2309_v50 = vld [vmem:[#allocation5 + $0x110] sm:$0xf0]  ;;  %v2184_v0 = vor.u32 %v3221_v46, %v2181_v48 }
  0x6b   :  { %1793 = vmatpush.bf16.msra.mxu1 %v2232_v16  ;;  %1806 = vmatpush.bf16.msra.mxu2 %v2360_v22  ;;  %v3285_v55 = vld [vmem:[#allocation5 + $0x204] sm:$0xf]  ;;  %v2581_v58 = vld [vmem:[#allocation5 + $0x330] sm:$0xf0]  ;;  %v2312_v5 = vor.u32 %v3253_v49, %v2309_v50 }
  0x6c   :  { %1819 = vmatpush.bf16.msra.mxu3 %v2488_v23  ;;  %v3321_v57 = vld [vmem:[#allocation5 + $0x324] sm:$0xf]  ;;  %v2437_v59 = vld [vmem:[#allocation5 + $0x210] sm:$0xf0] }
  0x6d   :  { %1832 = vmatpush.bf16.msrb.mxu0 %v2616_v35  ;;  %v3377_v60 = vld [vmem:[#allocation5 + $0x4e4] sm:$0xf]  ;;  %v2805_v61 = vld [vmem:[#allocation5 + $0x4f0] sm:$0xf0]  ;;  %v2584_v3 = vor.u32 %v3321_v57, %v2581_v58  ;;  %v2440_v6 = vor.u32 %v3285_v55, %v2437_v59 }
  0x6e   :  { %v3409_v62 = vld [vmem:[#allocation5 + $0x5e4] sm:$0xf]  ;;  %v2933_v63 = vld [vmem:[#allocation5 + $0x5f0] sm:$0xf0]  ;;  %v2808_v9 = vor.u32 %v3377_v60, %v2805_v61 }
  0x6f   :  { %1794 = vmatpush.bf16.msra.mxu1 %v2216_v31  ;;  %1807 = vmatpush.bf16.msra.mxu2 %v2344_v37  ;;  %v3441_v1 = vld [vmem:[#allocation5 + $0x6e4] sm:$0xf]  ;;  %v3061_v2 = vld [vmem:[#allocation5 + $0x6f0] sm:$0xf0]  ;;  %v2936_v10 = vor.u32 %v3409_v62, %v2933_v63 }
  0x70   :  { %1820 = vmatpush.bf16.msra.mxu3 %v2472_v39  ;;  %v3317_v7 = vld [vmem:[#allocation5 + $0x304] sm:$0xf]  ;;  %v2565_v8 = vld [vmem:[#allocation5 + $0x310] sm:$0xf0]  ;;  %v3064_v14 = vor.u32 %v3441_v1, %v3061_v2 }
  0x71   :  { %1833 = vmatpush.bf16.msrb.mxu0 %v2600_v51  ;;  %v3373_v11 = vld [vmem:[#allocation5 + $0x4c4] sm:$0xf]  ;;  %v3189_v13 = vld [vmem:[#allocation5 + $0x7f0] sm:$0xf0]  ;;  %v2568_v22 = vor.u32 %v3317_v7, %v2565_v8 }
  0x72   :  { %v3473_v12 = vld [vmem:[#allocation5 + $0x7e4] sm:$0xf]  ;;  %v2789_v15 = vld [vmem:[#allocation5 + $0x4d0] sm:$0xf0] }
  0x73   :  { %1795 = vmatpush.bf16.msra.mxu1 %v2200_v47  ;;  %1808 = vmatpush.bf16.msra.mxu2 %v2328_v53  ;;  %v3405_v16 = vld [vmem:[#allocation5 + $0x5c4] sm:$0xf]  ;;  %v2917_v19 = vld [vmem:[#allocation5 + $0x5d0] sm:$0xf0]  ;;  %v3192_v23 = vor.u32 %v3473_v12, %v3189_v13  ;;  %v2792_v24 = vor.u32 %v3373_v11, %v2789_v15 }
  0x74   :  { %1821 = vmatpush.bf16.msra.mxu3 %v2456_v54  ;;  %v3437_v20 = vld [vmem:[#allocation5 + $0x6c4] sm:$0xf]  ;;  %v3045_v21 = vld [vmem:[#allocation5 + $0x6d0] sm:$0xf0]  ;;  %v2920_v25 = vor.u32 %v3405_v16, %v2917_v19 }
  0x75   :  { %1834 = vmatpush.bf16.msrb.mxu0 %v2584_v3  ;;  %v3369_v26 = vld [vmem:[#allocation5 + $0x4a4] sm:$0xf]  ;;  %v3173_v29 = vld [vmem:[#allocation5 + $0x7d0] sm:$0xf0]  ;;  %v3048_v30 = vor.u32 %v3437_v20, %v3045_v21 }
  0x76   :  { %v3469_v28 = vld [vmem:[#allocation5 + $0x7c4] sm:$0xf]  ;;  %v2773_v31 = vld [vmem:[#allocation5 + $0x4b0] sm:$0xf0] }
  0x77   :  { %1796 = vmatpush.bf16.msra.mxu1 %v2184_v0  ;;  %1809 = vmatpush.bf16.msra.mxu2 %v2312_v5  ;;  %v3401_v33 = vld [vmem:[#allocation5 + $0x5a4] sm:$0xf]  ;;  %v2901_v34 = vld [vmem:[#allocation5 + $0x5b0] sm:$0xf0]  ;;  %v3176_v39 = vor.u32 %v3469_v28, %v3173_v29  ;;  %v2776_v40 = vor.u32 %v3369_v26, %v2773_v31 }
  0x78   :  { %1822 = vmatpush.bf16.msra.mxu3 %v2440_v6  ;;  %v3433_v35 = vld [vmem:[#allocation5 + $0x6a4] sm:$0xf]  ;;  %v3029_v37 = vld [vmem:[#allocation5 + $0x6b0] sm:$0xf0]  ;;  %v2904_v41 = vor.u32 %v3401_v33, %v2901_v34 }
  0x79   :  { %1835 = vmatpush.bf16.msrb.mxu0 %v2568_v22  ;;  %v3365_v42 = vld [vmem:[#allocation5 + $0x484] sm:$0xf]  ;;  %v3157_v44 = vld [vmem:[#allocation5 + $0x7b0] sm:$0xf0]  ;;  %v3032_v45 = vor.u32 %v3433_v35, %v3029_v37 }
  0x7a   :  { %1797 = vmatmul.bf16.vlgmr.msra.gmra.mxu1 %v3641_v56  ;;  %1810 = vmatmul.bf16.vlgmr.msra.gmra.mxu2 %v3649_v18  ;;  %v3465_v43 = vld [vmem:[#allocation5 + $0x7a4] sm:$0xf]  ;;  %v2757_v46 = vld [vmem:[#allocation5 + $0x490] sm:$0xf0] }
  0x7b   :  { %1841 = vmatpush.bf16.msrb.mxu1 %v2808_v9  ;;  %1854 = vmatpush.bf16.msrb.mxu2 %v2936_v10  ;;  %v3397_v47 = vld [vmem:[#allocation5 + $0x584] sm:$0xf]  ;;  %v2885_v48 = vld [vmem:[#allocation5 + $0x590] sm:$0xf0]  ;;  %v3160_v51 = vor.u32 %v3465_v43, %v3157_v44  ;;  %v2760_v53 = vor.u32 %v3365_v42, %v2757_v46  ;;  %v2299_v44 = vld [vmem:[#allocation5 + $0xe8] sm:$0xf] }
  0x7c   :  { %1867 = vmatpush.bf16.msrb.mxu3 %v3064_v14  ;;  %1836 = vmatmul.bf16.vlgmr.msrb.gmra.mxu0 %v3647_v17  ;;  %v3429_v49 = vld [vmem:[#allocation5 + $0x684] sm:$0xf]  ;;  %v3013_v50 = vld [vmem:[#allocation5 + $0x690] sm:$0xf0]  ;;  %v2888_v54 = vor.u32 %v3397_v47, %v2885_v48  ;;  %v2427_v46 = vld [vmem:[#allocation5 + $0x1e8] sm:$0xf] }
  0x7d   :  { %1880 = vmatpush.bf16.msra.mxu0 %v3192_v23  ;;  %1823 = vmatmul.bf16.vlgmr.msra.gmra.mxu3 %v3644_v4  ;;  %v3361_v55 = vld [vmem:[#allocation5 + $0x464] sm:$0xf]  ;;  %v3141_v58 = vld [vmem:[#allocation5 + $0x790] sm:$0xf0]  ;;  %v3016_v59 = vor.u32 %v3429_v49, %v3013_v50  ;;  %v3284_v47 = vld [vmem:[#allocation5 + $0x1f4] sm:$0xf0] }
  0x7e   :  { %v3461_v57 = vld [vmem:[#allocation5 + $0x784] sm:$0xf]  ;;  %v2741_v60 = vld [vmem:[#allocation5 + $0x470] sm:$0xf0] }
  0x7f   :  { %1842 = vmatpush.bf16.msrb.mxu1 %v2792_v24  ;;  %1855 = vmatpush.bf16.msrb.mxu2 %v2920_v25  ;;  %v3393_v61 = vld [vmem:[#allocation5 + $0x564] sm:$0xf]  ;;  %v2869_v62 = vld [vmem:[#allocation5 + $0x570] sm:$0xf0]  ;;  %v3144_v1 = vor.u32 %v3461_v57, %v3141_v58  ;;  %v2744_v2 = vor.u32 %v3361_v55, %v2741_v60  ;;  %v3248_v58 = vld [vmem:[#allocation5 + $0xd4] sm:$0xf0] }
  0x80   :  { %1868 = vmatpush.bf16.msrb.mxu3 %v3048_v30  ;;  %v3425_v63 = vld [vmem:[#allocation5 + $0x664] sm:$0xf]  ;;  %v2997_v0 = vld [vmem:[#allocation5 + $0x670] sm:$0xf0]  ;;  %v2872_v3 = vor.u32 %v3393_v61, %v2869_v62  ;;  %v2428_v61 = vor.u32 %v3284_v47, %v2427_v46  ;;  %v2411_v62 = vld [vmem:[#allocation5 + $0x1c8] sm:$0xf] }
  0x81   :  { %1881 = vmatpush.bf16.msra.mxu0 %v3176_v39  ;;  %v3357_v5 = vld [vmem:[#allocation5 + $0x444] sm:$0xf]  ;;  %v3125_v7 = vld [vmem:[#allocation5 + $0x770] sm:$0xf0]  ;;  %v3000_v8 = vor.u32 %v3425_v63, %v2997_v0  ;;  %v2555_v63 = vld [vmem:[#allocation5 + $0x2e8] sm:$0xf] }
  0x82   :  { %v3457_v6 = vld [vmem:[#allocation5 + $0x764] sm:$0xf]  ;;  %v2725_v9 = vld [vmem:[#allocation5 + $0x450] sm:$0xf0]  ;;  %v3316_v0 = vld [vmem:[#allocation5 + $0x2f4] sm:$0xf0] }
  0x83   :  { %1843 = vmatpush.bf16.msrb.mxu1 %v2776_v40  ;;  %1856 = vmatpush.bf16.msrb.mxu2 %v2904_v41  ;;  %v3389_v10 = vld [vmem:[#allocation5 + $0x544] sm:$0xf]  ;;  %v2853_v11 = vld [vmem:[#allocation5 + $0x550] sm:$0xf0]  ;;  %v3128_v14 = vor.u32 %v3457_v6, %v3125_v7  ;;  %v2728_v15 = vor.u32 %v3357_v5, %v2725_v9  ;;  %v3348_v5 = vld [vmem:[#allocation5 + $0x3f4] sm:$0xf0] }
  0x84   :  { %1869 = vmatpush.bf16.msrb.mxu3 %v3032_v45  ;;  %v3421_v12 = vld [vmem:[#allocation5 + $0x644] sm:$0xf]  ;;  %v2981_v13 = vld [vmem:[#allocation5 + $0x650] sm:$0xf0]  ;;  %v2856_v16 = vor.u32 %v3389_v10, %v2853_v11  ;;  %v3252_v45 = vld [vmem:[#allocation5 + $0xf4] sm:$0xf0]  ;;  %v2556_v10 = vor.u32 %v3316_v0, %v2555_v63 }
  0x85   :  { %1882 = vmatpush.bf16.msra.mxu0 %v3160_v51  ;;  %v3353_v19 = vld [vmem:[#allocation5 + $0x424] sm:$0xf]  ;;  %v3109_v21 = vld [vmem:[#allocation5 + $0x750] sm:$0xf0]  ;;  %v2984_v22 = vor.u32 %v3421_v12, %v2981_v13  ;;  %v2300_v57 = vor.u32 %v3252_v45, %v2299_v44  ;;  %v3244_v9 = vld [vmem:[#allocation5 + $0xb4] sm:$0xf0] }
  0x86   :  { %v3453_v20 = vld [vmem:[#allocation5 + $0x744] sm:$0xf]  ;;  %v2709_v23 = vld [vmem:[#allocation5 + $0x430] sm:$0xf0]  ;;  %v2395_v12 = vld [vmem:[#allocation5 + $0x1a8] sm:$0xf] }
  0x87   :  { %1844 = vmatpush.bf16.msrb.mxu1 %v2760_v53  ;;  %1857 = vmatpush.bf16.msrb.mxu2 %v2888_v54  ;;  %v3385_v24 = vld [vmem:[#allocation5 + $0x524] sm:$0xf]  ;;  %v2837_v25 = vld [vmem:[#allocation5 + $0x530] sm:$0xf0]  ;;  %v3112_v31 = vor.u32 %v3453_v20, %v3109_v21  ;;  %v2712_v33 = vor.u32 %v3353_v19, %v2709_v23  ;;  %v2283_v54 = vld [vmem:[#allocation5 + $0xc8] sm:$0xf] }
  0x88   :  { %1870 = vmatpush.bf16.msrb.mxu3 %v3016_v59  ;;  %v3417_v26 = vld [vmem:[#allocation5 + $0x624] sm:$0xf]  ;;  %v2965_v28 = vld [vmem:[#allocation5 + $0x630] sm:$0xf0]  ;;  %v2840_v34 = vor.u32 %v3385_v24, %v2837_v25  ;;  %v2284_v7 = vor.u32 %v3248_v58, %v2283_v54  ;;  %v2667_v19 = vld [vmem:[#allocation5 + $0x3c8] sm:$0xf] }
  0x89   :  { %1883 = vmatpush.bf16.msra.mxu0 %v3144_v1  ;;  %v3349_v29 = vld [vmem:[#allocation5 + $0x404] sm:$0xf]  ;;  %v2693_v30 = vld [vmem:[#allocation5 + $0x410] sm:$0xf0]  ;;  %v2968_v40 = vor.u32 %v3417_v26, %v2965_v28  ;;  %v3344_v20 = vld [vmem:[#allocation5 + $0x3d4] sm:$0xf0] }
  0x8a   :  { %v3381_v35 = vld [vmem:[#allocation5 + $0x504] sm:$0xf]  ;;  %v3093_v39 = vld [vmem:[#allocation5 + $0x730] sm:$0xf0]  ;;  %v2696_v51 = vor.u32 %v3349_v29, %v2693_v30  ;;  %v3240_v23 = vld [vmem:[#allocation5 + $0x94] sm:$0xf0]  ;;  %v2668_v28 = vor.u32 %v3344_v20, %v2667_v19 }
  0x8b   :  { %1845 = vmatpush.bf16.msrb.mxu1 %v2744_v2  ;;  %1858 = vmatpush.bf16.msrb.mxu2 %v2872_v3  ;;  %v3449_v37 = vld [vmem:[#allocation5 + $0x724] sm:$0xf]  ;;  %v2821_v41 = vld [vmem:[#allocation5 + $0x510] sm:$0xf0]  ;;  %v3280_v2 = vld [vmem:[#allocation5 + $0x1d4] sm:$0xf0] }
  0x8c   :  { %1871 = vmatpush.bf16.msrb.mxu3 %v3000_v8  ;;  %v3413_v42 = vld [vmem:[#allocation5 + $0x604] sm:$0xf]  ;;  %v2949_v43 = vld [vmem:[#allocation5 + $0x610] sm:$0xf0]  ;;  %v3096_v48 = vor.u32 %v3449_v37, %v3093_v39  ;;  %v2824_v53 = vor.u32 %v3381_v35, %v2821_v41  ;;  %v2683_v3 = vld [vmem:[#allocation5 + $0x3e8] sm:$0xf]  ;;  %v2412_v11 = vor.u32 %v3280_v2, %v2411_v62 }
  0x8d   :  { %1884 = vmatpush.bf16.msra.mxu0 %v3128_v14  ;;  %v3477_v49 = vld [vmem:[#allocation5 + $0x804] sm:$0xf]  ;;  %v3205_v50 = vld [vmem:[#allocation5 + $0x810] sm:$0xf0]  ;;  %v2952_v55 = vor.u32 %v3413_v42, %v2949_v43  ;;  %v2267_v8 = vld [vmem:[#allocation5 + $0xa8] sm:$0xf]  ;;  %v2684_v13 = vor.u32 %v3348_v5, %v2683_v3 }
  0x8e   :  { %v3445_v59 = vld [vmem:[#allocation5 + $0x704] sm:$0xf]  ;;  %v3077_v60 = vld [vmem:[#allocation5 + $0x710] sm:$0xf0]  ;;  %v3208_v1 = vor.u32 %v3477_v49, %v3205_v50  ;;  %v2539_v14 = vld [vmem:[#allocation5 + $0x2c8] sm:$0xf]  ;;  %v2268_v21 = vor.u32 %v3244_v9, %v2267_v8 }
  0x8f   :  { %1846 = vmatpush.bf16.msrb.mxu1 %v2728_v15  ;;  %1859 = vmatpush.bf16.msrb.mxu2 %v2856_v16  ;;  %v3080_v6 = vor.u32 %v3445_v59, %v3077_v60  ;;  %v3312_v15 = vld [vmem:[#allocation5 + $0x2d4] sm:$0xf0]  ;;  %v2379_v26 = vld [vmem:[#allocation5 + $0x188] sm:$0xf] }
  0x90   :  { %1872 = vmatpush.bf16.msrb.mxu3 %v2984_v22  ;;  %v3276_v16 = vld [vmem:[#allocation5 + $0x1b4] sm:$0xf0]  ;;  %v2251_v22 = vld [vmem:[#allocation5 + $0x88] sm:$0xf]  ;;  %v2540_v24 = vor.u32 %v3312_v15, %v2539_v14 }
  0x91   :  { %1885 = vmatpush.bf16.msra.mxu0 %v3112_v31  ;;  %v2396_v25 = vor.u32 %v3276_v16, %v2395_v12  ;;  %v2523_v29 = vld [vmem:[#allocation5 + $0x2a8] sm:$0xf]  ;;  %v3308_v30 = vld [vmem:[#allocation5 + $0x2b4] sm:$0xf0]  ;;  %v2252_v35 = vor.u32 %v3240_v23, %v2251_v22 }
  0x92   :  { %v3272_v31 = vld [vmem:[#allocation5 + $0x194] sm:$0xf0]  ;;  %v2235_v37 = vld [vmem:[#allocation5 + $0x68] sm:$0xf] }
  0x93   :  { %1847 = vmatpush.bf16.msrb.mxu1 %v2712_v33  ;;  %1860 = vmatpush.bf16.msrb.mxu2 %v2840_v34  ;;  %v2651_v33 = vld [vmem:[#allocation5 + $0x3a8] sm:$0xf]  ;;  %v3340_v34 = vld [vmem:[#allocation5 + $0x3b4] sm:$0xf0]  ;;  %v2380_v41 = vor.u32 %v3272_v31, %v2379_v26 }
  0x94   :  { %1873 = vmatpush.bf16.msrb.mxu3 %v2968_v40  ;;  %v3236_v39 = vld [vmem:[#allocation5 + $0x74] sm:$0xf0]  ;;  %v2524_v40 = vor.u32 %v3308_v30, %v2523_v29  ;;  %v2363_v42 = vld [vmem:[#allocation5 + $0x168] sm:$0xf]  ;;  %v2652_v43 = vor.u32 %v3340_v34, %v2651_v33 }
  0x95   :  { %1886 = vmatpush.bf16.msra.mxu0 %v3096_v48  ;;  %v2507_v44 = vld [vmem:[#allocation5 + $0x288] sm:$0xf]  ;;  %v3304_v45 = vld [vmem:[#allocation5 + $0x294] sm:$0xf0]  ;;  %v2236_v49 = vor.u32 %v3236_v39, %v2235_v37 }
  0x96   :  { %v3268_v46 = vld [vmem:[#allocation5 + $0x174] sm:$0xf0]  ;;  %v2635_v47 = vld [vmem:[#allocation5 + $0x388] sm:$0xf] }
  0x97   :  { %1848 = vmatpush.bf16.msrb.mxu1 %v2696_v51  ;;  %1861 = vmatpush.bf16.msrb.mxu2 %v2824_v53  ;;  %v3336_v48 = vld [vmem:[#allocation5 + $0x394] sm:$0xf0]  ;;  %v2219_v50 = vld [vmem:[#allocation5 + $0x48] sm:$0xf]  ;;  %v2508_v53 = vor.u32 %v3304_v45, %v2507_v44  ;;  %v2364_v54 = vor.u32 %v3268_v46, %v2363_v42 }
  0x98   :  { %1874 = vmatpush.bf16.msrb.mxu3 %v2952_v55  ;;  %v3232_v51 = vld [vmem:[#allocation5 + $0x54] sm:$0xf0]  ;;  %v2347_v55 = vld [vmem:[#allocation5 + $0x148] sm:$0xf] }
  0x99   :  { %1887 = vmatpush.bf16.msra.mxu0 %v3080_v6  ;;  %v2491_v58 = vld [vmem:[#allocation5 + $0x268] sm:$0xf]  ;;  %v3300_v59 = vld [vmem:[#allocation5 + $0x274] sm:$0xf0]  ;;  %v2220_v63 = vor.u32 %v3232_v51, %v2219_v50 }
  0x9a   :  { %1849 = vmatmul.bf16.vlgmr.msrb.gmra.mxu1 %v3653_v32  ;;  %1862 = vmatmul.bf16.vlgmr.msrb.gmra.mxu2 %v3661_v52  ;;  %v3264_v60 = vld [vmem:[#allocation5 + $0x154] sm:$0xf0]  ;;  %v2203_v0 = vld [vmem:[#allocation5 + $0x28] sm:$0xf]  ;;  %v2492_v2 = vor.u32 %v3300_v59, %v2491_v58 }
  0x9b   :  { %1906 = vmatpush.bf16.msra.mxu2 %v2300_v57  ;;  %1900 = vmatpush.bf16.msra.mxu1 %v3208_v1  ;;  %v2636_v57 = vor.u32 %v3336_v48, %v2635_v47  ;;  %v3332_v62 = vld [vmem:[#allocation5 + $0x374] sm:$0xf0]  ;;  %v2348_v3 = vor.u32 %v3264_v60, %v2347_v55  ;;  %v2331_v5 = vld [vmem:[#allocation5 + $0x128] sm:$0xf] }
  0x9c   :  { %1919 = vmatpush.bf16.msra.mxu3 %v2428_v61  ;;  %1888 = vmatmul.bf16.vlgmr.msra.gmra.mxu0 %v3657_v38  ;;  %v2619_v61 = vld [vmem:[#allocation5 + $0x368] sm:$0xf]  ;;  %v3228_v1 = vld [vmem:[#allocation5 + $0x34] sm:$0xf0] }
  0x9d   :  { %1875 = vmatmul.bf16.vlgmr.msrb.gmra.mxu3 %v3655_v36  ;;  %1932 = vmatpush.bf16.msrb.mxu0 %v2556_v10  ;;  %v2620_v6 = vor.u32 %v3332_v62, %v2619_v61  ;;  %v3296_v8 = vld [vmem:[#allocation5 + $0x254] sm:$0xf0]  ;;  %v2603_v10 = vld [vmem:[#allocation5 + $0x348] sm:$0xf]  ;;  %v2204_v12 = vor.u32 %v3228_v1, %v2203_v0 }
  0x9e   :  { %v3260_v9 = vld [vmem:[#allocation5 + $0x134] sm:$0xf0]  ;;  %v2315_v15 = vld [vmem:[#allocation5 + $0x108] sm:$0xf] }
  0x9f   :  { %1907 = vmatpush.bf16.msra.mxu2 %v2284_v7  ;;  %1945 = vmatpush.bf16.msrb.mxu1 %v2684_v13  ;;  %v2475_v7 = vld [vmem:[#allocation5 + $0x248] sm:$0xf]  ;;  %v3224_v14 = vld [vmem:[#allocation5 + $0x14] sm:$0xf0]  ;;  %v2332_v19 = vor.u32 %v3260_v9, %v2331_v5 }
  0xa0   :  { %1920 = vmatpush.bf16.msra.mxu3 %v2412_v11  ;;  %v3328_v11 = vld [vmem:[#allocation5 + $0x354] sm:$0xf0]  ;;  %v2187_v13 = vld [vmem:[#allocation5 + $0x8] sm:$0xf]  ;;  %v2476_v16 = vor.u32 %v3296_v8, %v2475_v7 }
  0xa1   :  { %1933 = vmatpush.bf16.msrb.mxu0 %v2540_v24  ;;  %v3256_v20 = vld [vmem:[#allocation5 + $0x114] sm:$0xf0]  ;;  %v2459_v22 = vld [vmem:[#allocation5 + $0x228] sm:$0xf]  ;;  %v2188_v31 = vor.u32 %v3224_v14, %v2187_v13 }
  0xa2   :  { %v3292_v23 = vld [vmem:[#allocation5 + $0x234] sm:$0xf0]  ;;  %v2811_v24 = vld [vmem:[#allocation5 + $0x4e8] sm:$0xf] }
  0xa3   :  { %1908 = vmatpush.bf16.msra.mxu2 %v2268_v21  ;;  %1946 = vmatpush.bf16.msrb.mxu1 %v2668_v28  ;;  %v2604_v21 = vor.u32 %v3328_v11, %v2603_v10  ;;  %v2939_v26 = vld [vmem:[#allocation5 + $0x5e8] sm:$0xf]  ;;  %v3412_v28 = vld [vmem:[#allocation5 + $0x5f4] sm:$0xf0]  ;;  %v2460_v33 = vor.u32 %v3292_v23, %v2459_v22 }
  0xa4   :  { %1921 = vmatpush.bf16.msra.mxu3 %v2396_v25  ;;  %v3380_v25 = vld [vmem:[#allocation5 + $0x4f4] sm:$0xf0]  ;;  %v2587_v29 = vld [vmem:[#allocation5 + $0x328] sm:$0xf]  ;;  %v2940_v42 = vor.u32 %v3412_v28, %v2939_v26 }
  0xa5   :  { %1934 = vmatpush.bf16.msrb.mxu0 %v2524_v40  ;;  %v3324_v30 = vld [vmem:[#allocation5 + $0x334] sm:$0xf0]  ;;  %v2795_v34 = vld [vmem:[#allocation5 + $0x4c8] sm:$0xf]  ;;  %v2812_v37 = vor.u32 %v3380_v25, %v2811_v24 }
  0xa6   :  { %v3376_v39 = vld [vmem:[#allocation5 + $0x4d4] sm:$0xf0]  ;;  %v2443_v40 = vld [vmem:[#allocation5 + $0x208] sm:$0xf]  ;;  %v2588_v44 = vor.u32 %v3324_v30, %v2587_v29 }
  0xa7   :  { %1909 = vmatpush.bf16.msra.mxu2 %v2252_v35  ;;  %1947 = vmatpush.bf16.msrb.mxu1 %v2652_v43  ;;  %v2316_v35 = vor.u32 %v3256_v20, %v2315_v15  ;;  %v2923_v43 = vld [vmem:[#allocation5 + $0x5c8] sm:$0xf]  ;;  %v3444_v46 = vld [vmem:[#allocation5 + $0x6f4] sm:$0xf0] }
  0xa8   :  { %1922 = vmatpush.bf16.msra.mxu3 %v2380_v41  ;;  %v3288_v41 = vld [vmem:[#allocation5 + $0x214] sm:$0xf0]  ;;  %v3067_v45 = vld [vmem:[#allocation5 + $0x6e8] sm:$0xf] }
  0xa9   :  { %1935 = vmatpush.bf16.msrb.mxu0 %v2508_v53  ;;  %v3408_v47 = vld [vmem:[#allocation5 + $0x5d4] sm:$0xf0]  ;;  %v2571_v48 = vld [vmem:[#allocation5 + $0x308] sm:$0xf]  ;;  %v2444_v50 = vor.u32 %v3288_v41, %v2443_v40 }
  0xaa   :  { %3218 = vmatmul.msk.bf16.vlgmr.msra.gmra.mxu1 %vm1668_vm0, %v3665_v27  ;;  %v3195_v51 = vld [vmem:[#allocation5 + $0x7e8] sm:$0xf]  ;;  %v3476_v53 = vld [vmem:[#allocation5 + $0x7f4] sm:$0xf0]  ;;  %v2924_v58 = vor.u32 %v3408_v47, %v2923_v43 }
  0xab   :  { %1910 = vmatpush.bf16.msra.mxu2 %v2236_v49  ;;  %1948 = vmatpush.bf16.msrb.mxu1 %v2636_v57  ;;  %v3320_v49 = vld [vmem:[#allocation5 + $0x314] sm:$0xf0]  ;;  %v2779_v55 = vld [vmem:[#allocation5 + $0x4a8] sm:$0xf]  ;;  %v3068_v57 = vor.u32 %v3444_v46, %v3067_v45  ;;  %v3196_v1 = vor.u32 %v3476_v53, %v3195_v51 }
  0xac   :  { %1923 = vmatpush.bf16.msra.mxu3 %v2364_v54  ;;  %v2796_v54 = vor.u32 %v3376_v39, %v2795_v34  ;;  %v3372_v59 = vld [vmem:[#allocation5 + $0x4b4] sm:$0xf0]  ;;  %v2572_v60 = vor.u32 %v3320_v49, %v2571_v48  ;;  %v3051_v61 = vld [vmem:[#allocation5 + $0x6c8] sm:$0xf] }
  0xad   :  { %1936 = vmatpush.bf16.msrb.mxu0 %v2492_v2  ;;  %v3440_v62 = vld [vmem:[#allocation5 + $0x6d4] sm:$0xf0]  ;;  %v3179_v2 = vld [vmem:[#allocation5 + $0x7c8] sm:$0xf]  ;;  %v2780_v5 = vor.u32 %v3372_v59, %v2779_v55 }
  0xae   :  { %v3404_v0 = vld [vmem:[#allocation5 + $0x5b4] sm:$0xf0]  ;;  %v3052_v7 = vor.u32 %v3440_v62, %v3051_v61  ;;  %v3035_v10 = vld [vmem:[#allocation5 + $0x6a8] sm:$0xf] }
  0xaf   :  { %1911 = vmatpush.bf16.msra.mxu2 %v2220_v63  ;;  %1949 = vmatpush.bf16.msrb.mxu1 %v2620_v6  ;;  %v2907_v63 = vld [vmem:[#allocation5 + $0x5a8] sm:$0xf]  ;;  %v3368_v9 = vld [vmem:[#allocation5 + $0x494] sm:$0xf0] }
  0xb0   :  { %1924 = vmatpush.bf16.msra.mxu3 %v2348_v3  ;;  %v3472_v3 = vld [vmem:[#allocation5 + $0x7d4] sm:$0xf0]  ;;  %v2763_v6 = vld [vmem:[#allocation5 + $0x488] sm:$0xf]  ;;  %v2908_v8 = vor.u32 %v3404_v0, %v2907_v63 }
  0xb1   :  { %1937 = vmatpush.bf16.msrb.mxu0 %v2476_v16  ;;  %v3436_v11 = vld [vmem:[#allocation5 + $0x6b4] sm:$0xf0]  ;;  %v3180_v14 = vor.u32 %v3472_v3, %v3179_v2  ;;  %v3163_v15 = vld [vmem:[#allocation5 + $0x7a8] sm:$0xf]  ;;  %v2764_v20 = vor.u32 %v3368_v9, %v2763_v6 }
  0xb2   :  { %v3400_v13 = vld [vmem:[#allocation5 + $0x594] sm:$0xf0]  ;;  %v3036_v22 = vor.u32 %v3436_v11, %v3035_v10  ;;  %v3019_v25 = vld [vmem:[#allocation5 + $0x688] sm:$0xf] }
  0xb3   :  { %1912 = vmatpush.bf16.msra.mxu2 %v2204_v12  ;;  %1950 = vmatpush.bf16.msrb.mxu1 %v2604_v21  ;;  %v2891_v12 = vld [vmem:[#allocation5 + $0x588] sm:$0xf]  ;;  %v3468_v16 = vld [vmem:[#allocation5 + $0x7b4] sm:$0xf0] }
  0xb4   :  { %1925 = vmatpush.bf16.msra.mxu3 %v2332_v19  ;;  %v3682_v19 = vld [vmem:[#allocation7] sm:$0xf]  ;;  %v2747_v21 = vld [vmem:[#allocation5 + $0x468] sm:$0xf]  ;;  %v2892_v23 = vor.u32 %v3400_v13, %v2891_v12  ;;  %v3364_v24 = vld [vmem:[#allocation5 + $0x474] sm:$0xf0]  ;;  %v1681_v28 = vpop.f32.mrf.mxu0 }
  0xb5   :  { %1938 = vmatpush.bf16.msrb.mxu0 %v2460_v33  ;;  %v3432_v26 = vld [vmem:[#allocation5 + $0x694] sm:$0xf0]  ;;  %v2875_v29 = vld [vmem:[#allocation5 + $0x568] sm:$0xf]  ;;  %v360_v33 = vperm.slane %v3682_v19, 0 }
  0xb6   :  { %v3396_v30 = vld [vmem:[#allocation5 + $0x574] sm:$0xf0]  ;;  %v3147_v34 = vld [vmem:[#allocation5 + $0x788] sm:$0xf]  ;;  %v3020_v40 = vor.u32 %v3432_v26, %v3019_v25  ;;  %v2301_v25 = vld [vmem:[#allocation5 + $0xf8] sm:$0xf0] }
  0xb7   :  { %1913 = vmatpush.bf16.msra.mxu2 %v2188_v31  ;;  %1951 = vmatpush.bf16.msrb.mxu1 %v2588_v44  ;;  %v3164_v31 = vor.u32 %v3468_v16, %v3163_v15  ;;  %v2731_v39 = vld [vmem:[#allocation5 + $0x448] sm:$0xf]  ;;  %v2876_v41 = vor.u32 %v3396_v30, %v2875_v29  ;;  %v3428_v44 = vld [vmem:[#allocation5 + $0x674] sm:$0xf0]  ;;  %v1682_v48 = vadd.f32 %v1681_v28, %v360_v33 }
  0xb8   :  { %1926 = vmatpush.bf16.msra.mxu3 %v2316_v35  ;;  %v3464_v35 = vld [vmem:[#allocation5 + $0x794] sm:$0xf0]  ;;  %v3003_v43 = vld [vmem:[#allocation5 + $0x668] sm:$0xf] }
  0xb9   :  { %1939 = vmatpush.bf16.msrb.mxu0 %v2444_v50  ;;  %v2859_v45 = vld [vmem:[#allocation5 + $0x548] sm:$0xf]  ;;  %v3392_v46 = vld [vmem:[#allocation5 + $0x554] sm:$0xf0]  ;;  %v3148_v47 = vor.u32 %v3464_v35, %v3147_v34  ;;  %v2685_v35 = vld [vmem:[#allocation5 + $0x3f8] sm:$0xf0] }
  0xba   :  { %1914 = vmatmul.bf16.vlgmr.msra.gmra.mxu2 %v3641_v56  ;;  %v3131_v49 = vld [vmem:[#allocation5 + $0x768] sm:$0xf]  ;;  %v3460_v50 = vld [vmem:[#allocation5 + $0x774] sm:$0xf0]  ;;  %v2860_v55 = vor.u32 %v3392_v46, %v2859_v45  ;;  %v2429_v45 = vld [vmem:[#allocation5 + $0x1f8] sm:$0xf0] }
  0xbb   :  { %1958 = vmatpush.bf16.msrb.mxu2 %v2812_v37  ;;  %1927 = vmatmul.bf16.vlgmr.msra.gmra.mxu3 %v3649_v18  ;;  %v2748_v37 = vor.u32 %v3364_v24, %v2747_v21  ;;  %v2715_v53 = vld [vmem:[#allocation5 + $0x428] sm:$0xf]  ;;  %v3424_v59 = vld [vmem:[#allocation5 + $0x654] sm:$0xf0]  ;;  %v3132_v0 = vor.u32 %v3460_v50, %v3131_v49  ;;  %v2285_v46 = vld [vmem:[#allocation5 + $0xd8] sm:$0xf0] }
  0xbc   :  { %1971 = vmatpush.bf16.msrb.mxu3 %v2940_v42  ;;  %1952 = vmatpush.bf16.msrb.mxu1 %v2572_v60  ;;  %v3360_v42 = vld [vmem:[#allocation5 + $0x454] sm:$0xf0]  ;;  %v1683_v60 = vpop.f32.mrf.mxu0  ;;  %v2843_v62 = vld [vmem:[#allocation5 + $0x528] sm:$0xf] }
  0xbd   :  { %1984 = vmatpush.bf16.msra.mxu0 %v3068_v57  ;;  %v2732_v51 = vor.u32 %v3360_v42, %v2731_v39  ;;  %v3356_v57 = vld [vmem:[#allocation5 + $0x434] sm:$0xf0]  ;;  %v3115_v2 = vld [vmem:[#allocation5 + $0x748] sm:$0xf]  ;;  %v3246_v42 = vld [vmem:[#allocation5 + $0xcc] sm:$0xf] }
  0xbe   :  { %1940 = vmatmul.bf16.vlgmr.msrb.gmra.mxu0 %v3644_v4  ;;  %v3388_v63 = vld [vmem:[#allocation5 + $0x534] sm:$0xf0]  ;;  %v2716_v6 = vor.u32 %v3356_v57, %v2715_v53  ;;  %v2827_v9 = vld [vmem:[#allocation5 + $0x508] sm:$0xf]  ;;  %v3314_v53 = vld [vmem:[#allocation5 + $0x2ec] sm:$0xf]  ;;  %v2288_v60 = vor.u32 %v3246_v42, %v2285_v46 }
  0xbf   :  { %1959 = vmatpush.bf16.msrb.mxu2 %v2796_v54  ;;  %1953 = vmatmul.bf16.vlgmr.msrb.gmra.mxu1 %v3647_v17  ;;  %v3004_v54 = vor.u32 %v3428_v44, %v3003_v43  ;;  %v3456_v3 = vld [vmem:[#allocation5 + $0x754] sm:$0xf0]  ;;  %v2844_v12 = vor.u32 %v3388_v63, %v2843_v62  ;;  %v3099_v26 = vld [vmem:[#allocation5 + $0x728] sm:$0xf]  ;;  %v3282_v44 = vld [vmem:[#allocation5 + $0x1ec] sm:$0xf] }
  0xc0   :  { %1972 = vmatpush.bf16.msrb.mxu3 %v2924_v58  ;;  %1997 = vmatpush.bf16.msra.mxu1 %v3196_v1  ;;  %v2987_v58 = vld [vmem:[#allocation5 + $0x648] sm:$0xf]  ;;  %v3384_v13 = vld [vmem:[#allocation5 + $0x514] sm:$0xf0]  ;;  %v3116_v21 = vor.u32 %v3456_v3, %v3115_v2  ;;  %v3342_v57 = vld [vmem:[#allocation5 + $0x3cc] sm:$0xf] }
  0xc1   :  { %1985 = vmatpush.bf16.msra.mxu0 %v3052_v7  ;;  %v2699_v7 = vld [vmem:[#allocation5 + $0x408] sm:$0xf]  ;;  %v2988_v10 = vor.u32 %v3424_v59, %v2987_v58  ;;  %v3420_v15 = vld [vmem:[#allocation5 + $0x634] sm:$0xf0]  ;;  %v2828_v33 = vor.u32 %v3384_v13, %v2827_v9  ;;  %v2669_v58 = vld [vmem:[#allocation5 + $0x3d8] sm:$0xf0] }
  0xc2   :  { %v3452_v28 = vld [vmem:[#allocation5 + $0x734] sm:$0xf0]  ;;  %v3278_v62 = vld [vmem:[#allocation5 + $0x1cc] sm:$0xf]  ;;  %v2413_v63 = vld [vmem:[#allocation5 + $0x1d8] sm:$0xf0]  ;;  %v2672_v3 = vor.u32 %v3342_v57, %v2669_v58 }
  0xc3   :  { %1960 = vmatpush.bf16.msrb.mxu2 %v2780_v5  ;;  %v1694_v61 = vpop.f32.mrf.mxu1  ;;  %v1707_v5 = vpop.f32.mrf.mxu2  ;;  %v3416_v39 = vld [vmem:[#allocation5 + $0x614] sm:$0xf0]  ;;  %v3100_v43 = vor.u32 %v3452_v28, %v3099_v26  ;;  %v2653_v9 = vld [vmem:[#allocation5 + $0x3b8] sm:$0xf0]  ;;  %v3238_v13 = vld [vmem:[#allocation5 + $0x8c] sm:$0xf] }
  0xc4   :  { %1973 = vmatpush.bf16.msrb.mxu3 %v2908_v8  ;;  %1998 = vmatpush.bf16.msra.mxu1 %v3180_v14  ;;  %v1695_v1 = vadd.f32 %v1694_v61, %v1682_v48  ;;  %v3352_v8 = vld [vmem:[#allocation5 + $0x414] sm:$0xf0]  ;;  %v2971_v14 = vld [vmem:[#allocation5 + $0x628] sm:$0xf]  ;;  %v3270_v28 = vld [vmem:[#allocation5 + $0x18c] sm:$0xf] }
  0xc5   :  { %1986 = vmatpush.bf16.msra.mxu0 %v3036_v22  ;;  %v3211_v22 = vld [vmem:[#allocation5 + $0x808] sm:$0xf]  ;;  %v2700_v29 = vor.u32 %v3352_v8, %v2699_v7  ;;  %v2972_v30 = vor.u32 %v3420_v15, %v2971_v14  ;;  %v3448_v48 = vld [vmem:[#allocation5 + $0x714] sm:$0xf0]  ;;  %v2416_v7 = vor.u32 %v3278_v62, %v2413_v63  ;;  %v3338_v8 = vld [vmem:[#allocation5 + $0x3ac] sm:$0xf] }
  0xc6   :  { %v1708_v11 = vadd.f32 %v1707_v5, %v1695_v1  ;;  %v2269_v1 = vld [vmem:[#allocation5 + $0xb8] sm:$0xf0]  ;;  %v3310_v5 = vld [vmem:[#allocation5 + $0x2cc] sm:$0xf] }
  0xc7   :  { %1961 = vmatpush.bf16.msrb.mxu2 %v2764_v20  ;;  %v3250_v20 = vld [vmem:[#allocation5 + $0xec] sm:$0xf]  ;;  %v2253_v14 = vld [vmem:[#allocation5 + $0x98] sm:$0xf0] }
  0xc8   :  { %1974 = vmatpush.bf16.msrb.mxu3 %v2892_v23  ;;  %1999 = vmatpush.bf16.msra.mxu1 %v3164_v31  ;;  %v1720_v16 = vpop.f32.mrf.mxu3  ;;  %v3480_v23 = vld [vmem:[#allocation5 + $0x814] sm:$0xf0]  ;;  %v3346_v31 = vld [vmem:[#allocation5 + $0x3ec] sm:$0xf]  ;;  %v2256_v26 = vor.u32 %v3238_v13, %v2253_v14  ;;  %v2365_v46 = vld [vmem:[#allocation5 + $0x178] sm:$0xf0] }
  0xc9   :  { %1987 = vmatpush.bf16.msra.mxu0 %v3020_v40  ;;  %v3686_v24 = vadd.f32 %v1720_v16, %v1708_v11  ;;  %v3212_v34 = vor.u32 %v3480_v23, %v3211_v22  ;;  %v2688_v50 = vor.u32 %v3346_v31, %v2685_v35  ;;  %v3274_v11 = vld [vmem:[#allocation5 + $0x1ac] sm:$0xf]  ;;  %v2656_v16 = vor.u32 %v3338_v8, %v2653_v9  ;;  %v2477_v9 = vld [vmem:[#allocation5 + $0x258] sm:$0xf0] }
  0xca   :  { %v3334_v23 = vld [vmem:[#allocation5 + $0x38c] sm:$0xf] }
  0xcb   :  { %1962 = vmatpush.bf16.msrb.mxu2 %v2748_v37  ;;  %v2955_v37 = vld [vmem:[#allocation5 + $0x608] sm:$0xf]  ;;  %v1696_v40 = vpop.f32.mrf.mxu1  ;;  %v1709_v49 = vpop.f32.mrf.mxu2  ;;  %v3234_v31 = vld [vmem:[#allocation5 + $0x6c] sm:$0xf] }
  0xcc   :  { %1975 = vmatpush.bf16.msrb.mxu3 %v2876_v41  ;;  %2000 = vmatpush.bf16.msra.mxu1 %v3148_v47  ;;  %v2304_v41 = vor.u32 %v3250_v20, %v2301_v25  ;;  %v3083_v47 = vld [vmem:[#allocation5 + $0x708] sm:$0xf]  ;;  %v3306_v20 = vld [vmem:[#allocation5 + $0x2ac] sm:$0xf]  ;;  %v2637_v25 = vld [vmem:[#allocation5 + $0x398] sm:$0xf0] }
  0xcd   :  { %1988 = vmatpush.bf16.msra.mxu0 %v3004_v54  ;;  %v2557_v54 = vld [vmem:[#allocation5 + $0x2f8] sm:$0xf0]  ;;  %v3084_v61 = vor.u32 %v3448_v48, %v3083_v47  ;;  %v3330_v42 = vld [vmem:[#allocation5 + $0x36c] sm:$0xf] }
  0xce   :  { %v2560_v2 = vor.u32 %v3314_v53, %v2557_v54  ;;  %v2509_v40 = vld [vmem:[#allocation5 + $0x298] sm:$0xf0]  ;;  %v3230_v48 = vld [vmem:[#allocation5 + $0x4c] sm:$0xf] }
  0xcf   :  { %1963 = vmatpush.bf16.msrb.mxu2 %v2732_v51  ;;  %v2956_v51 = vor.u32 %v3416_v39, %v2955_v37  ;;  %v2640_v37 = vor.u32 %v3334_v23, %v2637_v25  ;;  %v3302_v39 = vld [vmem:[#allocation5 + $0x28c] sm:$0xf]  ;;  %v2221_v49 = vld [vmem:[#allocation5 + $0x58] sm:$0xf0] }
  0xd0   :  { %1976 = vmatpush.bf16.msrb.mxu3 %v2860_v55  ;;  %2001 = vmatpush.bf16.msra.mxu1 %v3132_v0  ;;  %v2432_v55 = vor.u32 %v3282_v44, %v2429_v45  ;;  %v1722_v59 = vpop.f32.mrf.mxu3  ;;  %v3242_v0 = vld [vmem:[#allocation5 + $0xac] sm:$0xf]  ;;  %v2493_v54 = vld [vmem:[#allocation5 + $0x278] sm:$0xf0] }
  0xd1   :  { %1989 = vmatpush.bf16.msra.mxu0 %v2988_v10  ;;  %v2272_v10 = vor.u32 %v3242_v0, %v2269_v1  ;;  %v3266_v45 = vld [vmem:[#allocation5 + $0x16c] sm:$0xf]  ;;  %v2605_v59 = vld [vmem:[#allocation5 + $0x358] sm:$0xf0] }
  0xd2   :  { %v3298_v53 = vld [vmem:[#allocation5 + $0x26c] sm:$0xf]  ;;  %v2368_v57 = vor.u32 %v3266_v45, %v2365_v46  ;;  %v2349_v0 = vld [vmem:[#allocation5 + $0x158] sm:$0xf0] }
  0xd3   :  { %1964 = vmatpush.bf16.msrb.mxu2 %v2716_v6  ;;  %v2541_v6 = vld [vmem:[#allocation5 + $0x2d8] sm:$0xf0]  ;;  %v3326_v58 = vld [vmem:[#allocation5 + $0x34c] sm:$0xf] }
  0xd4   :  { %1977 = vmatpush.bf16.msrb.mxu3 %v2844_v12  ;;  %2002 = vmatpush.bf16.msra.mxu1 %v3116_v21  ;;  %v2397_v12 = vld [vmem:[#allocation5 + $0x1b8] sm:$0xf0]  ;;  %v2544_v15 = vor.u32 %v3310_v5, %v2541_v6  ;;  %v3262_v63 = vld [vmem:[#allocation5 + $0x14c] sm:$0xf]  ;;  %v2496_v5 = vor.u32 %v3298_v53, %v2493_v54 }
  0xd5   :  { %1990 = vmatpush.bf16.msra.mxu0 %v2972_v30  ;;  %v2525_v21 = vld [vmem:[#allocation5 + $0x2b8] sm:$0xf0]  ;;  %v2400_v22 = vor.u32 %v3274_v11, %v2397_v12  ;;  %v1733_v30 = vpop.f32.mrf.mxu0  ;;  %v3294_v8 = vld [vmem:[#allocation5 + $0x24c] sm:$0xf] }
  0xd6   :  { %v1734_v35 = vadd.f32 %v1733_v30, %v3686_v24  ;;  %v3322_v11 = vld [vmem:[#allocation5 + $0x32c] sm:$0xf]  ;;  %v2589_v12 = vld [vmem:[#allocation5 + $0x338] sm:$0xf0] }
  0xd7   :  { %1965 = vmatpush.bf16.msrb.mxu2 %v2700_v29  ;;  %v2381_v29 = vld [vmem:[#allocation5 + $0x198] sm:$0xf0]  ;;  %v1746_v47 = vpop.f32.mrf.mxu1  ;;  %v3258_v14 = vld [vmem:[#allocation5 + $0x12c] sm:$0xf] }
  0xd8   :  { %1978 = vmatpush.bf16.msrb.mxu3 %v2828_v33  ;;  %2003 = vmatpush.bf16.msra.mxu1 %v3100_v43  ;;  %v2237_v33 = vld [vmem:[#allocation5 + $0x78] sm:$0xf0]  ;;  %v3254_v45 = vld [vmem:[#allocation5 + $0x10c] sm:$0xf] }
  0xd9   :  { %1991 = vmatpush.bf16.msra.mxu0 %v2956_v51  ;;  %v2621_v43 = vld [vmem:[#allocation5 + $0x378] sm:$0xf0]  ;;  %v2240_v44 = vor.u32 %v3234_v31, %v2237_v33  ;;  %v1747_v51 = vadd.f32 %v1746_v47, %v1734_v35  ;;  %v3318_v31 = vld [vmem:[#allocation5 + $0x30c] sm:$0xf] }
  0xda   :  { %1966 = vmatmul.bf16.vlgmr.msrb.gmra.mxu2 %v3653_v32  ;;  %v2624_v24 = vor.u32 %v3330_v42, %v2621_v43  ;;  %v2813_v25 = vld [vmem:[#allocation5 + $0x4f8] sm:$0xf0]  ;;  %v3374_v43 = vld [vmem:[#allocation5 + $0x4cc] sm:$0xf] }
  0xdb   :  { %2017 = vmatpush.bf16.msra.mxu2 %v3212_v34  ;;  %1979 = vmatmul.bf16.vlgmr.msrb.gmra.mxu3 %v3661_v52  ;;  %v2528_v34 = vor.u32 %v3306_v20, %v2525_v21  ;;  %v2189_v20 = vld [vmem:[#allocation5 + $0x18] sm:$0xf0]  ;;  %v3378_v21 = vld [vmem:[#allocation5 + $0x4ec] sm:$0xf] }
  0xdc   :  { %2023 = vmatpush.bf16.msra.mxu3 %v2304_v41  ;;  %2004 = vmatpush.bf16.msra.mxu1 %v3084_v61  ;;  %v2384_v41 = vor.u32 %v3270_v28, %v2381_v29  ;;  %v3290_v28 = vld [vmem:[#allocation5 + $0x22c] sm:$0xf]  ;;  %v2461_v29 = vld [vmem:[#allocation5 + $0x238] sm:$0xf0]  ;;  %v2816_v42 = vor.u32 %v3378_v21, %v2813_v25 }
  0xdd   :  { %2036 = vmatpush.bf16.msrb.mxu0 %v2432_v55  ;;  %v1759_v55 = vpop.f32.mrf.mxu2  ;;  %v1735_v1 = vpop.f32.mrf.mxu0  ;;  %v2573_v33 = vld [vmem:[#allocation5 + $0x318] sm:$0xf0]  ;;  %v3286_v53 = vld [vmem:[#allocation5 + $0x20c] sm:$0xf] }
  0xde   :  { %1992 = vmatmul.bf16.vlgmr.msra.gmra.mxu0 %v3655_v36  ;;  %v1760_v61 = vadd.f32 %v1759_v55, %v1747_v51  ;;  %v2317_v46 = vld [vmem:[#allocation5 + $0x118] sm:$0xf0]  ;;  %v3442_v55 = vld [vmem:[#allocation5 + $0x6ec] sm:$0xf] }
  0xdf   :  { %2062 = vmatpush.bf16.msrb.mxu2 %v2688_v50  ;;  %2005 = vmatmul.bf16.vlgmr.msra.gmra.mxu1 %v3657_v38  ;;  %v2512_v50 = vor.u32 %v3302_v39, %v2509_v40  ;;  %v1748_v23 = vpop.f32.mrf.mxu1  ;;  %v3197_v39 = vld [vmem:[#allocation5 + $0x7f8] sm:$0xf0]  ;;  %v3462_v25 = vld [vmem:[#allocation5 + $0x78c] sm:$0xf] }
  0xe0   :  { %2024 = vmatpush.bf16.msra.mxu3 %v2288_v60  ;;  %2049 = vmatpush.bf16.msrb.mxu1 %v2560_v2  ;;  %v2224_v60 = vor.u32 %v3230_v48, %v2221_v49  ;;  %v1772_v62 = vpop.f32.mrf.mxu3  ;;  %v3226_v2 = vld [vmem:[#allocation5 + $0x2c] sm:$0xf]  ;;  %v2797_v48 = vld [vmem:[#allocation5 + $0x4d8] sm:$0xf0]  ;;  %v2576_v49 = vor.u32 %v3318_v31, %v2573_v33 }
  0xe1   :  { %2037 = vmatpush.bf16.msrb.mxu0 %v2416_v7  ;;  %v1773_v6 = vadd.f32 %v1772_v62, %v1760_v61  ;;  %v2608_v7 = vor.u32 %v3326_v58, %v2605_v59  ;;  %v2941_v51 = vld [vmem:[#allocation5 + $0x5f8] sm:$0xf0]  ;;  %v3470_v59 = vld [vmem:[#allocation5 + $0x7cc] sm:$0xf]  ;;  %v2800_v61 = vor.u32 %v3374_v43, %v2797_v48 }
  0xe2   :  { %v2445_v54 = vld [vmem:[#allocation5 + $0x218] sm:$0xf0]  ;;  %v3370_v62 = vld [vmem:[#allocation5 + $0x4ac] sm:$0xf] }
  0xe3   :  { %2063 = vmatpush.bf16.msrb.mxu2 %v2672_v3  ;;  %v2205_v3 = vld [vmem:[#allocation5 + $0x38] sm:$0xf0]  ;;  %v2448_v1 = vor.u32 %v3286_v53, %v2445_v54  ;;  %v3398_v33 = vld [vmem:[#allocation5 + $0x58c] sm:$0xf] }
  0xe4   :  { %2025 = vmatpush.bf16.msra.mxu3 %v2272_v10  ;;  %2050 = vmatpush.bf16.msrb.mxu1 %v2544_v15  ;;  %v2352_v10 = vor.u32 %v3262_v63, %v2349_v0  ;;  %v2208_v13 = vor.u32 %v3226_v2, %v2205_v3  ;;  %v2333_v15 = vld [vmem:[#allocation5 + $0x138] sm:$0xf0]  ;;  %v3406_v2 = vld [vmem:[#allocation5 + $0x5cc] sm:$0xf] }
  0xe5   :  { %2038 = vmatpush.bf16.msrb.mxu0 %v2400_v22  ;;  %v2480_v22 = vor.u32 %v3294_v8, %v2477_v9  ;;  %v2336_v30 = vor.u32 %v3258_v14, %v2333_v15  ;;  %v3069_v58 = vld [vmem:[#allocation5 + $0x6f8] sm:$0xf0]  ;;  %v3466_v9 = vld [vmem:[#allocation5 + $0x7ac] sm:$0xf] }
  0xe6   :  { %v2781_v0 = vld [vmem:[#allocation5 + $0x4b8] sm:$0xf0]  ;;  %v3426_v53 = vld [vmem:[#allocation5 + $0x66c] sm:$0xf] }
  0xe7   :  { %2064 = vmatpush.bf16.msrb.mxu2 %v2656_v16  ;;  %v3222_v16 = vld [vmem:[#allocation5 + $0xc] sm:$0xf]  ;;  %v2925_v3 = vld [vmem:[#allocation5 + $0x5d8] sm:$0xf0] }
  0xe8   :  { %2026 = vmatpush.bf16.msra.mxu3 %v2256_v26  ;;  %2051 = vmatpush.bf16.msrb.mxu1 %v2528_v34  ;;  %v2592_v26 = vor.u32 %v3322_v11, %v2589_v12  ;;  %v1761_v34 = vpop.f32.mrf.mxu2  ;;  %v2192_v35 = vor.u32 %v3222_v16, %v2189_v20  ;;  %v1774_v40 = vpop.f32.mrf.mxu3  ;;  %v3053_v8 = vld [vmem:[#allocation5 + $0x6d8] sm:$0xf0]  ;;  %v2784_v11 = vor.u32 %v3370_v62, %v2781_v0  ;;  %v3366_v12 = vld [vmem:[#allocation5 + $0x48c] sm:$0xf] }
  0xe9   :  { %2039 = vmatpush.bf16.msrb.mxu0 %v2384_v41  ;;  %v1785_v41 = vpop.f32.mrf.mxu0  ;;  %v2765_v15 = vld [vmem:[#allocation5 + $0x498] sm:$0xf0]  ;;  %v3402_v16 = vld [vmem:[#allocation5 + $0x5ac] sm:$0xf] }
  0xea   :  { %3219 = vmatmul.msk.bf16.vlgmr.msra.gmra.mxu2 %vm1668_vm0, %v3665_v27  ;;  %v3695_v47 = vadd.f32 %v1785_v41, %v1773_v6  ;;  %v2909_v20 = vld [vmem:[#allocation5 + $0x5b8] sm:$0xf0]  ;;  %v3430_v40 = vld [vmem:[#allocation5 + $0x68c] sm:$0xf] }
  0xeb   :  { %2065 = vmatpush.bf16.msrb.mxu2 %v2640_v37  ;;  %v3474_v37 = vld [vmem:[#allocation5 + $0x7ec] sm:$0xf]  ;;  %v3037_v23 = vld [vmem:[#allocation5 + $0x6b8] sm:$0xf0]  ;;  %v2912_v31 = vor.u32 %v3402_v16, %v2909_v20 }
  0xec   :  { %2027 = vmatpush.bf16.msra.mxu3 %v2240_v44  ;;  %2052 = vmatpush.bf16.msrb.mxu1 %v2512_v50  ;;  %v2464_v44 = vor.u32 %v3290_v28, %v2461_v29  ;;  %v3410_v50 = vld [vmem:[#allocation5 + $0x5ec] sm:$0xf]  ;;  %v2768_v28 = vor.u32 %v3366_v12, %v2765_v15  ;;  %v2893_v34 = vld [vmem:[#allocation5 + $0x598] sm:$0xf0] }
  0xed   :  { %2040 = vmatpush.bf16.msrb.mxu0 %v2368_v57  ;;  %v2320_v57 = vor.u32 %v3254_v45, %v2317_v46  ;;  %v2944_v63 = vor.u32 %v3410_v50, %v2941_v51  ;;  %v3362_v29 = vld [vmem:[#allocation5 + $0x46c] sm:$0xf]  ;;  %v3021_v41 = vld [vmem:[#allocation5 + $0x698] sm:$0xf0]  ;;  %v2896_v45 = vor.u32 %v3398_v33, %v2893_v34 }
  0xee   :  { %v2733_v46 = vld [vmem:[#allocation5 + $0x458] sm:$0xf0]  ;;  %v3386_v16 = vld [vmem:[#allocation5 + $0x52c] sm:$0xf] }
  0xef   :  { %2066 = vmatpush.bf16.msrb.mxu2 %v2624_v24  ;;  %v3200_v24 = vor.u32 %v3474_v37, %v3197_v39  ;;  %v2877_v50 = vld [vmem:[#allocation5 + $0x578] sm:$0xf0] }
  0xf0   :  { %2028 = vmatpush.bf16.msra.mxu3 %v2224_v60  ;;  %2053 = vmatpush.bf16.msrb.mxu1 %v2496_v5  ;;  %v3181_v60 = vld [vmem:[#allocation5 + $0x7d8] sm:$0xf0]  ;;  %v3072_v5 = vor.u32 %v3442_v55, %v3069_v58  ;;  %v3454_v55 = vld [vmem:[#allocation5 + $0x74c] sm:$0xf] }
  0xf1   :  { %2041 = vmatpush.bf16.msrb.mxu0 %v2352_v10  ;;  %v3184_v6 = vor.u32 %v3470_v59, %v3181_v60  ;;  %v3165_v10 = vld [vmem:[#allocation5 + $0x7b8] sm:$0xf0]  ;;  %v1787_v14 = vpop.f32.mrf.mxu0  ;;  %v3354_v59 = vld [vmem:[#allocation5 + $0x42c] sm:$0xf] }
  0xf2   :  { %v3168_v21 = vor.u32 %v3466_v9, %v3165_v10  ;;  %v3005_v54 = vld [vmem:[#allocation5 + $0x678] sm:$0xf0]  ;;  %v3450_v9 = vld [vmem:[#allocation5 + $0x72c] sm:$0xf] }
  0xf3   :  { %2067 = vmatpush.bf16.msrb.mxu2 %v2608_v7  ;;  %v3438_v7 = vld [vmem:[#allocation5 + $0x6cc] sm:$0xf]  ;;  %v2717_v62 = vld [vmem:[#allocation5 + $0x438] sm:$0xf0] }
  0xf4   :  { %2029 = vmatpush.bf16.msra.mxu3 %v2208_v13  ;;  %2054 = vmatpush.bf16.msrb.mxu1 %v2480_v22  ;;  %v2928_v13 = vor.u32 %v3406_v2, %v2925_v3  ;;  %v3434_v22 = vld [vmem:[#allocation5 + $0x6ac] sm:$0xf]  ;;  %v2861_v0 = vld [vmem:[#allocation5 + $0x558] sm:$0xf0]  ;;  %v2720_v12 = vor.u32 %v3354_v59, %v2717_v62 }
  0xf5   :  { %2042 = vmatpush.bf16.msrb.mxu0 %v2336_v30  ;;  %v2749_v30 = vld [vmem:[#allocation5 + $0x478] sm:$0xf0]  ;;  %v3040_v37 = vor.u32 %v3434_v22, %v3037_v23 }
  0xf6   :  { %v2752_v43 = vor.u32 %v3362_v29, %v2749_v30  ;;  %v3101_v10 = vld [vmem:[#allocation5 + $0x738] sm:$0xf0]  ;;  %v3446_v30 = vld [vmem:[#allocation5 + $0x70c] sm:$0xf] }
  0xf7   :  { %2068 = vmatpush.bf16.msrb.mxu2 %v2592_v26  ;;  %v3149_v26 = vld [vmem:[#allocation5 + $0x798] sm:$0xf0]  ;;  %v3104_v23 = vor.u32 %v3450_v9, %v3101_v10 }
  0xf8   :  { %2030 = vmatpush.bf16.msra.mxu3 %v2192_v35  ;;  %2055 = vmatpush.bf16.msrb.mxu1 %v2464_v44  ;;  %v1798_v35 = vpop.f32.mrf.mxu1  ;;  %v3152_v39 = vor.u32 %v3462_v25, %v3149_v26  ;;  %v3358_v44 = vld [vmem:[#allocation5 + $0x44c] sm:$0xf]  ;;  %v2701_v15 = vld [vmem:[#allocation5 + $0x418] sm:$0xf0] }
  0xf9   :  { %2043 = vmatpush.bf16.msrb.mxu0 %v2320_v57  ;;  %v1837_v51 = vpop.f32.mrf.mxu0  ;;  %v3117_v57 = vld [vmem:[#allocation5 + $0x758] sm:$0xf0]  ;;  %v2736_v58 = vor.u32 %v3358_v44, %v2733_v46  ;;  %v3478_v25 = vld [vmem:[#allocation5 + $0x80c] sm:$0xf] }
  0xfa   :  { %v2845_v20 = vld [vmem:[#allocation5 + $0x538] sm:$0xf0] }
  0xfb   :  { %2069 = vmatpush.bf16.msrb.mxu2 %v2576_v49  ;;  %2031 = vmatmul.bf16.vlgmr.msra.gmra.mxu3 %v3641_v56  ;;  %v3056_v56 = vor.u32 %v3438_v7, %v3053_v8  ;;  %v3394_v49 = vld [vmem:[#allocation5 + $0x56c] sm:$0xf]  ;;  %v2989_v8 = vld [vmem:[#allocation5 + $0x658] sm:$0xf0]  ;;  %v2848_v34 = vor.u32 %v3386_v16, %v2845_v20 }
  0xfc   :  { %2075 = vmatpush.bf16.msrb.mxu3 %v2816_v42  ;;  %2056 = vmatpush.bf16.msrb.mxu1 %v2448_v1  ;;  %v3133_v42 = vld [vmem:[#allocation5 + $0x778] sm:$0xf0]  ;;  %v2880_v60 = vor.u32 %v3394_v49, %v2877_v50  ;;  %v3422_v7 = vld [vmem:[#allocation5 + $0x64c] sm:$0xf] }
  0xfd   :  { %2088 = vmatpush.bf16.msra.mxu0 %v2944_v63  ;;  %v3390_v63 = vld [vmem:[#allocation5 + $0x54c] sm:$0xf]  ;;  %v2992_v22 = vor.u32 %v3422_v7, %v2989_v8  ;;  %v3213_v26 = vld [vmem:[#allocation5 + $0x818] sm:$0xf0] }
  0xfe   :  { %2070 = vmatmul.bf16.vlgmr.msrb.gmra.mxu2 %v3647_v17  ;;  %2044 = vmatmul.bf16.vlgmr.msrb.gmra.mxu0 %v3649_v18  ;;  %v361_v17 = vperm.slane %v3682_v19, 1  ;;  %v3458_v18 = vld [vmem:[#allocation5 + $0x76c] sm:$0xf]  ;;  %v2864_v14 = vor.u32 %v3390_v63, %v2861_v0  ;;  %v2973_v29 = vld [vmem:[#allocation5 + $0x638] sm:$0xf0] }
  0xff   :  { %2114 = vmatpush.bf16.msra.mxu2 %v3200_v24  ;;  %2057 = vmatmul.bf16.vlgmr.msrb.gmra.mxu1 %v3644_v4  ;;  %v3024_v4 = vor.u32 %v3430_v40, %v3021_v41  ;;  %v3136_v24 = vor.u32 %v3458_v18, %v3133_v42  ;;  %v3414_v42 = vld [vmem:[#allocation5 + $0x60c] sm:$0xf] }
 0x100   :  { %2076 = vmatpush.bf16.msrb.mxu3 %v2800_v61  ;;  %2101 = vmatpush.bf16.msra.mxu1 %v3072_v5  ;;  %v1799_v48 = vadd.f32 %v1798_v35, %v361_v17  ;;  %v1811_v61 = vpop.f32.mrf.mxu2  ;;  %v1800_v1 = vpop.f32.mrf.mxu1  ;;  %v3008_v5 = vor.u32 %v3426_v53, %v3005_v54  ;;  %v3216_v35 = vor.u32 %v3478_v25, %v3213_v26 }
 0x101   :  { %2089 = vmatpush.bf16.msra.mxu0 %v2928_v13  ;;  %v1824_v3 = vpop.f32.mrf.mxu3  ;;  %v3350_v13 = vld [vmem:[#allocation5 + $0x40c] sm:$0xf]  ;;  %v362_v1 = vperm.slane %v3682_v19, 2 }
 0x102   :  { %v1812_v2 = vadd.f32 %v1811_v61, %v1799_v48  ;;  %v2704_v33 = vor.u32 %v3350_v13, %v2701_v15 }
 0x103   :  { %2115 = vmatpush.bf16.msra.mxu2 %v3184_v6  ;;  %v3120_v6 = vor.u32 %v3454_v55, %v3117_v57  ;;  %v3708_v55 = vld [vmem:[#allocation8] sm:$0xf] }
 0x104   :  { %2077 = vmatpush.bf16.msrb.mxu3 %v2784_v11  ;;  %2102 = vmatpush.bf16.msra.mxu1 %v3056_v56  ;;  %v1825_v11 = vadd.f32 %v1824_v3, %v1812_v2 }
 0x105   :  { %2090 = vmatpush.bf16.msra.mxu0 %v2912_v31  ;;  %v3085_v31 = vld [vmem:[#allocation5 + $0x718] sm:$0xf0] }
 0x106   :  { %v1838_v56 = vadd.f32 %v1837_v51, %v1825_v11  ;;  %v3088_v18 = vor.u32 %v3446_v30, %v3085_v31 }
 0x107   :  { %2116 = vmatpush.bf16.msra.mxu2 %v3168_v21  ;;  %v1839_v21 = vpop.f32.mrf.mxu0 }
 0x108   :  { %2078 = vmatpush.bf16.msrb.mxu3 %v2768_v28  ;;  %2103 = vmatpush.bf16.msra.mxu1 %v3040_v37  ;;  %v3418_v28 = vld [vmem:[#allocation5 + $0x62c] sm:$0xf]  ;;  %v1813_v17 = vpop.f32.mrf.mxu2 }
 0x109   :  { %2091 = vmatpush.bf16.msra.mxu0 %v2896_v45  ;;  %v3382_v37 = vld [vmem:[#allocation5 + $0x50c] sm:$0xf]  ;;  %v1826_v40 = vpop.f32.mrf.mxu3  ;;  %v2976_v41 = vor.u32 %v3418_v28, %v2973_v29 }
 0x10b   :  { %2117 = vmatpush.bf16.msra.mxu2 %v3152_v39  ;;  %v2829_v39 = vld [vmem:[#allocation5 + $0x518] sm:$0xf0] }
 0x10c   :  { %2079 = vmatpush.bf16.msrb.mxu3 %v2752_v43  ;;  %2104 = vmatpush.bf16.msra.mxu1 %v3024_v4  ;;  %v2957_v43 = vld [vmem:[#allocation5 + $0x618] sm:$0xf0]  ;;  %v2832_v44 = vor.u32 %v3382_v37, %v2829_v39 }
 0x10d   :  { %2092 = vmatpush.bf16.msra.mxu0 %v2880_v60  ;;  %v2960_v45 = vor.u32 %v3414_v42, %v2957_v43  ;;  %v2147_v60 = vperm.slane %v3708_v55, 1 }
 0x10f   :  { %2118 = vmatpush.bf16.msra.mxu2 %v3136_v24 }
 0x110   :  { %2080 = vmatpush.bf16.msrb.mxu3 %v2736_v58  ;;  %2105 = vmatpush.bf16.msra.mxu1 %v3008_v5  ;;  %v2146_v58 = vperm.slane %v3708_v55, 0 }
 0x111   :  { %2093 = vmatpush.bf16.msra.mxu0 %v2864_v14 }
 0x113   :  { %2119 = vmatpush.bf16.msra.mxu2 %v3120_v6 }
 0x114   :  { %2081 = vmatpush.bf16.msrb.mxu3 %v2720_v12  ;;  %2106 = vmatpush.bf16.msra.mxu1 %v2992_v22 }
 0x115   :  { %2094 = vmatpush.bf16.msra.mxu0 %v2848_v34 }
 0x117   :  { %2120 = vmatpush.bf16.msra.mxu2 %v3104_v23  ;;  %v1850_v46 = vpop.f32.mrf.mxu1 }
 0x118   :  { %2082 = vmatpush.bf16.msrb.mxu3 %v2704_v33  ;;  %2107 = vmatpush.bf16.msra.mxu1 %v2976_v41  ;;  %v1851_v48 = vadd.f32 %v1850_v46, %v1838_v56  ;;  %v2148_v33 = vperm.slane %v3708_v55, 2  ;;  %v363_v46 = vperm.slane %v3682_v19, 3  ;;  %v2149_v19 = vperm.slane %v3708_v55, 3 }
 0x119   :  { %2095 = vmatpush.bf16.msra.mxu0 %v2832_v44  ;;  %v1889_v49 = vpop.f32.mrf.mxu0 }
 0x11b   :  { %2121 = vmatpush.bf16.msra.mxu2 %v3088_v18  ;;  %2083 = vmatmul.bf16.vlgmr.msrb.gmra.mxu3 %v3653_v32 }
 0x11c   :  { %2134 = vmatpush.bf16.msra.mxu3 %v3216_v35  ;;  %2108 = vmatpush.bf16.msra.mxu1 %v2960_v45 }
 0x11d   :  { %2096 = vmatmul.bf16.vlgmr.msra.gmra.mxu0 %v3661_v52  ;;  %v1863_v50 = vpop.f32.mrf.mxu2 }
 0x11e   :  { %2122 = vmatmul.bf16.vlgmr.msra.gmra.mxu2 %v3657_v38  ;;  %v1864_v51 = vadd.f32 %v1863_v50, %v1851_v48 }
 0x11f   :  { %2109 = vmatmul.bf16.vlgmr.msra.gmra.mxu1 %v3655_v36  ;;  %v1852_v24 = vpop.f32.mrf.mxu1  ;;  %v2140_v36 = vmax.f32 %v3695_v47, 0.0 }
 0x120   :  { %v1876_v4 = vpop.f32.mrf.mxu3 }
 0x121   :  { %v1877_v53 = vadd.f32 %v1876_v4, %v1864_v51  ;;  %v1891_v54 = vpop.f32.mrf.mxu0  ;;  %v2154_v62 = vmul.f32 %v2146_v58, %v2140_v36 }
 0x123   :  { %v1890_v32 = vadd.f32 %v1889_v49, %v1877_v53 }
 0x125   :  { %v1865_v38 = vpop.f32.mrf.mxu2 }
 0x127   :  { %v1902_v52 = vpop.f32.mrf.mxu1 }
 0x128   :  { %v1878_v57 = vpop.f32.mrf.mxu3  ;;  %v1903_v59 = vadd.f32 %v1902_v52, %v1890_v32 }
 0x12a   :  { %v2141_v61 = vmax.f32 %v1903_v59, 0.0 }
 0x12b   :  { %3220 = vmatmul.msk.bf16.vlgmr.msra.gmra.mxu3 %vm1668_vm0, %v3665_v27 }
 0x12c   :  { %v2155_v63 = vmul.f32 %v2147_v60, %v2141_v61 }
 0x12e   :  { %v2158_v27 = vadd.f32 %v2155_v63, %v2154_v62 }
 0x12f   :  { %v1904_v0 = vpop.f32.mrf.mxu1 }
 0x13b   :  { %v1941_v2 = vpop.f32.mrf.mxu0 }
 0x13c   :  { %v1954_v7 = vpop.f32.mrf.mxu1 }
 0x13d   :  { %v1915_v3 = vpop.f32.mrf.mxu2 }
 0x13e   :  { %v1916_v5 = vadd.f32 %v1915_v3, %v362_v1  ;;  %v1928_v6 = vpop.f32.mrf.mxu3 }
 0x140   :  { %v1929_v8 = vadd.f32 %v1928_v6, %v1916_v5 }
 0x142   :  { %v1942_v9 = vadd.f32 %v1941_v2, %v1929_v8  ;;  %v3487_v2 = vld [vmem:[#allocation2] ss:$0 sm:$0xff] }
 0x143   :  { %v1943_v47 = vpop.f32.mrf.mxu0 }
 0x144   :  { %v1955_v10 = vadd.f32 %v1954_v7, %v1942_v9  ;;  %v1956_v13 = vpop.f32.mrf.mxu1 }
 0x145   :  { %v1917_v11 = vpop.f32.mrf.mxu2 }
 0x146   :  { %v1930_v12 = vpop.f32.mrf.mxu3 }
 0x15b   :  { %v1993_v14 = vpop.f32.mrf.mxu0 }
 0x15c   :  { %v2006_v16 = vpop.f32.mrf.mxu1 }
 0x15d   :  { %v1967_v15 = vpop.f32.mrf.mxu2 }
 0x15e   :  { %v1968_v20 = vadd.f32 %v1967_v15, %v1955_v10  ;;  %v1980_v56 = vpop.f32.mrf.mxu3 }
 0x160   :  { %v1981_v21 = vadd.f32 %v1980_v56, %v1968_v20 }
 0x162   :  { %v1994_v22 = vadd.f32 %v1993_v14, %v1981_v21 }
 0x163   :  { %v1995_v23 = vpop.f32.mrf.mxu0 }
 0x164   :  { %v2007_v25 = vadd.f32 %v2006_v16, %v1994_v22  ;;  %v2008_v28 = vpop.f32.mrf.mxu1 }
 0x165   :  { %v1969_v26 = vpop.f32.mrf.mxu2 }
 0x166   :  { %v1982_v29 = vpop.f32.mrf.mxu3 }
 0x16d   :  { %v2019_v30 = vpop.f32.mrf.mxu2 }
 0x16e   :  { %v2020_v31 = vadd.f32 %v2019_v30, %v2007_v25 }
 0x170   :  { %v2142_v34 = vmax.f32 %v2020_v31, 0.0 }
 0x172   :  { %v2156_v17 = vmul.f32 %v2148_v33, %v2142_v34 }
 0x174   :  { %v2159_v35 = vadd.f32 %v2158_v27, %v2156_v17 }
 0x175   :  { %v2021_v37 = vpop.f32.mrf.mxu2 }
 0x17b   :  { %v2045_v39 = vpop.f32.mrf.mxu0 }
 0x17c   :  { %v2058_v41 = vpop.f32.mrf.mxu1 }
 0x17e   :  { %v2032_v40 = vpop.f32.mrf.mxu3 }
 0x17f   :  { %v2033_v48 = vadd.f32 %v2032_v40, %v363_v46 }
 0x181   :  { %v2071_v18 = vpop.f32.mrf.mxu2  ;;  %v2046_v49 = vadd.f32 %v2045_v39, %v2033_v48 }
 0x183   :  { %v2047_v42 = vpop.f32.mrf.mxu0  ;;  %v2059_v50 = vadd.f32 %v2058_v41, %v2046_v49 }
 0x184   :  { %v2060_v44 = vpop.f32.mrf.mxu1 }
 0x185   :  { %v2072_v53 = vadd.f32 %v2071_v18, %v2059_v50 }
 0x186   :  { %v2034_v43 = vpop.f32.mrf.mxu3 }
 0x189   :  { %v2073_v45 = vpop.f32.mrf.mxu2 }
 0x19a   :  { %v2097_v51 = vpop.f32.mrf.mxu0 }
 0x19c   :  { %v2110_v24 = vpop.f32.mrf.mxu1 }
 0x19e   :  { %v2084_v4 = vpop.f32.mrf.mxu3 }
 0x19f   :  { %v2085_v54 = vadd.f32 %v2084_v4, %v2072_v53 }
 0x1a1   :  { %v2123_v32 = vpop.f32.mrf.mxu2  ;;  %v2098_v57 = vadd.f32 %v2097_v51, %v2085_v54 }
 0x1a2   :  { %v2099_v38 = vpop.f32.mrf.mxu0 }
 0x1a3   :  { %v2111_v59 = vadd.f32 %v2110_v24, %v2098_v57 }
 0x1a4   :  { %v2112_v36 = vpop.f32.mrf.mxu1 }
 0x1a5   :  { %v2124_v60 = vadd.f32 %v2123_v32, %v2111_v59 }
 0x1a6   :  { %v2086_v52 = vpop.f32.mrf.mxu3 }
 0x1a9   :  { %v2125_v58 = vpop.f32.mrf.mxu2 }
 0x1ae   :  { %v2136_v61 = vpop.f32.mrf.mxu3 }
 0x1af   :  { %v2137_v62 = vadd.f32 %v2136_v61, %v2124_v60 }
 0x1b1   :  { %v2143_v63 = vmax.f32 %v2137_v62, 0.0 }
 0x1b3   :  { %v2157_v27 = vmul.f32 %v2149_v19, %v2143_v63 }
 0x1b5   :  { %v2160_v0 = vadd.f32 %v2159_v35, %v2157_v27 }
 0x1b6   :  { %v2138_v1 = vpop.f32.mrf.mxu3 }
 0x1b7   :  { %2161 = vadd.xlane.f32.xlu0 %v2160_v0 }
 0x22a   :  { %v2162_v3 = vpop.xlane.xlu0 %2161 }
 0x22b   :  { %v2167_v5 = vadd.f32 %v3487_v2, %v2162_v3 }
 0x22d   :  { %2169 = vst.msk [vmem:[%s3725_s5] sm:$0xff] %vm2168_vm1, %v2167_v5 }
 0x22e   :  { %2174 = vsyncpa [#allocation4], 1 }
 0x22f   :  { %2175 = vsyncpa [#allocation6], 1 }
 0x230   :  { %2176 = vsyncpa [#allocation9], 1 }

</bundles_post_ra>
